<compile_context>
chip_gen: v7x
topology: tpu7x:2x2x1
jax: 0.10.0
libtpu: 0.0.40
codegen_flags: <defaults>
</compile_context>

<pallas_src>
import numpy as np
import jax
import jax.numpy as jnp
from jax import lax
from jax.experimental import pallas as pl
from jax.experimental.pallas import tpu as pltpu


# ----------------------------------------------------------------------------
# constant pooling matrices (pure structure, no learned parameters)
# ----------------------------------------------------------------------------
def adaptive_pool1d_matrix(L, Lout):
    """P of shape (L, Lout) such that x @ P == AdaptiveAvgPool1d(Lout)(x)."""
    P = np.zeros((L, Lout), dtype=np.float32)
    for i in range(Lout):
        s = (i * L) // Lout
        e = -(-((i + 1) * L) // Lout)  # ceil
        P[s:e, i] = 1.0 / (e - s)
    return P


def adaptive_pool2d_matrix(H, W, side):
    """A of shape (H*W, side*side): x.reshape(.., H*W) @ A == AdaptiveAvgPool2d."""
    Ph = adaptive_pool1d_matrix(H, side)
    Pw = adaptive_pool1d_matrix(W, side)
    return np.einsum("hi,wj->hwij", Ph, Pw).reshape(H * W, side * side).astype(np.float32)


# ----------------------------------------------------------------------------
# in-kernel activations (overflow-safe, EUP-friendly)
# ----------------------------------------------------------------------------
def _mish(x):
    # x * tanh(softplus(x));  tanh(softplus(x)) = t(t+2)/(t(t+2)+2), t = exp(min(x,20))
    t = jnp.exp(jnp.minimum(x, 20.0))
    num = t * (t + 2.0)
    return x * (num * pl.reciprocal(num + 2.0, approx=True))


def _sigmoid(x):
    # one EUP exp + one approx reciprocal; clamp keeps the exp finite
    return pl.reciprocal(1.0 + jnp.exp(jnp.minimum(-x, 30.0)), approx=True)


# ----------------------------------------------------------------------------
# Pallas kernel
# ----------------------------------------------------------------------------
def _make_kernel(dims, c0, first_last):
    n_blocks = len(dims) - 1

    def kernel(*refs):
        x_ref, wf_ref, bf_ref = refs[0], refs[1], refs[2]
        block_refs = [(refs[3 + 2 * i], refs[4 + 2 * i]) for i in range(n_blocks)]
        out_ref = refs[3 + 2 * n_blocks]
        acc_ref = refs[4 + 2 * n_blocks]

        k = pl.program_id(1)

        @pl.when(k == 0)
        def _():
            acc_ref[...] = jnp.zeros_like(acc_ref)

        # AdaptiveAvgPool2d + 1x1 conv + Flatten + block-0 linear/pool, all folded
        # wrapper-side into one bf16 weight; f32 accumulation across the K tiles.
        acc_ref[...] += jnp.dot(x_ref[...], wf_ref[...],
                                preferred_element_type=jnp.float32)

        @pl.when(k == pl.num_programs(1) - 1)
        def _():
            z = acc_ref[...] + bf_ref[...]                      # (TB, Fc) f32
            if first_last:                                      # degenerate: single last block
                cur = _sigmoid(z)
            else:                                               # block-0 activation + residual
                cur = _mish(z[:, :c0]) + z[:, c0:]

            for (w_ref, s_ref), (_, cout, last) in zip(block_refs, dims[1:]):
                zb = jnp.dot(cur, w_ref[...], preferred_element_type=jnp.float32)
                if last:
                    cur = _sigmoid(zb + s_ref[...])
                else:
                    # [W | 0 | P]: linear part at lane 0, pool part at lane 128,
                    # so both slices are tile-aligned (no lane rotates).
                    cur = _mish(zb[:, :cout] + s_ref[...]) + zb[:, 128:]

            out_ref[...] = cur.astype(out_ref.dtype)

    return kernel


# ----------------------------------------------------------------------------
# tiling helpers (generation-aware)
# ----------------------------------------------------------------------------
def _vmem_budget():
    """(tile budget, vmem_limit cap) sized per TPU generation."""
    try:
        cap = int(pltpu.get_tpu_info().vmem_capacity_bytes)
    except Exception:                 # unknown / older jax: assume smallest (v7x)
        cap = 64 << 20
    if cap >= (100 << 20):            # v5e / v6e: 128 MiB physical VMEM
        return 48 << 20, 100 << 20
    return 20 << 20, 44 << 20         # v7x: 64 MiB physical, leave Mosaic headroom


def _pick_k_tile(chw, fc, itemsize, budget):
    """K tile over CHW for the front-end matmul.  Keep w_fused fully resident when
    it fits in ~1/3 of the budget; otherwise stream the largest multiple of 512
    that divides CHW and whose double-buffered (TK, Fc) slice fits that share."""
    share = budget // 3
    if chw * fc * itemsize <= share or chw % 512 != 0:
        return chw
    max_tk = max(512, (share // (2 * fc * itemsize)) // 512 * 512)
    for tk in range(max_tk, 511, -512):
        if chw % tk == 0:
            return tk
    return chw


def _pick_batch_tile(B, row_bytes, budget):
    """Batch tile (multiple of 16 for bf16 sublane packing) whose double-buffered
    (TB, TK) tile fits `budget`.  The batch is zero-padded up to a multiple of the
    tile (no oversized fallback tile), and B >= 32 always gets >= 2 grid steps so
    both v7x TensorCores receive work."""
    cap = max(16, (budget // (2 * row_bytes)) // 16 * 16)
    if B < 32 and 2 * B * row_bytes <= budget:
        return B, B                               # one full tile (tiny / ragged B)
    n_tiles = max(2 if B >= 32 else 1, pl.cdiv(B, cap))
    tb = min(cap, pl.cdiv(pl.cdiv(B, n_tiles), 16) * 16)
    return tb, pl.cdiv(B, tb) * tb


# ----------------------------------------------------------------------------
# builder: fold constants once, return a jitted forward(x)
# ----------------------------------------------------------------------------
def build_pool_selector(params, input_shape, *, eps=1e-5, single_buffer_consts=True):
    B, C, H, W = input_shape
    side, dims = params["side"], params["dims"]
    ss, F, CHW = side * side, side ** 3, C * H * W
    f32, bf16 = jnp.float32, jnp.bfloat16

    # ---- wrapper-side constant folding (runs once, at build time) -------------
    A = jnp.asarray(adaptive_pool2d_matrix(H, W, side))                   # (HW, ss)
    w_front = jnp.einsum("oc,hp->chop", params["wconv"].astype(f32), A).reshape(CHW, F)
    b_front = jnp.repeat(params["bconv"].astype(f32), ss)[None, :]        # (1, F)

    folded = []                                    # eval-mode BN folded into linears
    for blk, (cin, cout, last) in zip(params["blocks"], dims):
        scale = blk["gamma"] / jnp.sqrt(blk["rvar"] + eps)
        w_f = blk["w"].T.astype(f32) * scale[None, :]                     # (cin, cout)
        shift = (blk["beta"] - blk["rmean"] * scale)[None, :]             # (1, cout)
        folded.append((w_f, shift))

    # fold block 0's linear / pool into the front-end matmul (no nonlinearity
    # sits between the 1x1 conv and block 0's linear)
    (w0, shift0), (cin0, cout0, last0) = folded[0], dims[0]
    if last0:
        wf = w_front @ w0                                                 # (CHW, 1)
        bias_row = b_front @ w0 + shift0
        fc = cout0
    else:
        pool0 = jnp.asarray(adaptive_pool1d_matrix(cin0, cout0))          # (F, F//2)
        w0cat = jnp.concatenate([w0, pool0], axis=1)                      # (F, F)
        wf = w_front @ w0cat                                              # (CHW, F)
        bias_row = (b_front @ w0cat).at[:, :cout0].add(shift0)
        fc = 2 * cout0

    consts = [wf.astype(bf16), bias_row.astype(f32)]
    for (w_f, shift), (cin, cout, last) in zip(folded[1:], dims[1:]):
        if last:
            consts += [w_f.astype(bf16), shift.astype(f32)]
        else:
            pool_m = jnp.asarray(adaptive_pool1d_matrix(cin, cout))
            w_cat = jnp.zeros((cin, 128 + cout), f32)                     # [W | 0 | P]
            w_cat = w_cat.at[:, :cout].set(w_f).at[:, 128:].set(pool_m)
            consts += [w_cat.astype(bf16), shift.astype(f32)]

    # ---- generation-aware tiling ----------------------------------------------
    budget, limit_cap = _vmem_budget()
    TK = _pick_k_tile(CHW, fc, 2, budget)
    n_k = CHW // TK
    wf_bufs = (1 if single_buffer_consts else 2) if n_k == 1 else 2
    x_budget = max(budget - wf_bufs * TK * fc * 2, budget // 4)
    TB, Bp = _pick_batch_tile(B, TK * 2, x_budget)
    grid = (Bp // TB, n_k)

    def _const_spec(shape):
        if single_buffer_consts:
            return pl.BlockSpec(shape, lambda i, k: (0, 0),
                                pipeline_mode=pl.Buffered(1))
        return pl.BlockSpec(shape, lambda i, k: (0, 0))

    if n_k == 1:
        wf_spec = _const_spec((CHW, fc))                       # resident, DMA'd once
    else:
        wf_spec = pl.BlockSpec((TK, fc), lambda i, k: (k, 0))  # streamed K slices
    in_specs = [pl.BlockSpec((TB, TK), lambda i, k: (i, k)), wf_spec]
    in_specs += [_const_spec(a.shape) for a in consts[1:]]
    out_spec = pl.BlockSpec((TB, 1), lambda i, k: (i, 0))

    # ---- cost estimate + VMEM limit --------------------------------------------
    const_bytes = sum(int(np.prod(a.shape)) * a.dtype.itemsize for a in consts)
    flops = 2 * Bp * CHW * fc + sum(2 * Bp * cin * (cout if last else 128 + cout)
                                    for cin, cout, last in dims[1:])
    cost = pl.CostEstimate(
        flops=int(flops),
        transcendentals=int(Bp * sum(cout for _, cout, _ in dims)),
        bytes_accessed=int(Bp * CHW * 2 + const_bytes + Bp * 4))
    vmem_est = (wf_bufs * TK * fc * 2 + 2 * TB * TK * 2 + TB * fc * 4
                + 2 * TB * 4 + 2 * const_bytes + (4 << 20))
    vmem_limit = int(min(limit_cap, max(vmem_est, 16 << 20)))

    call = pl.pallas_call(
        _make_kernel(dims, cout0, last0),
        out_shape=jax.ShapeDtypeStruct((Bp, 1), jnp.float32),
        grid=grid,
        in_specs=in_specs,
        out_specs=out_spec,
        scratch_shapes=[pltpu.VMEM((TB, fc), jnp.float32)],
        compiler_params=pltpu.CompilerParams(
            dimension_semantics=("parallel", "arbitrary"),
            vmem_limit_bytes=vmem_limit),
        cost_estimate=cost,
    )

    consts = tuple(consts)

    def fwd(x):
        # NOTE: in a real pipeline x should already arrive as bf16; the cast here
        # is the documented bf16-operand choice from the perf review.
        xb = x.reshape(B, CHW).astype(bf16)
        if Bp != B:
            xb = jnp.pad(xb, ((0, Bp - B), (0, 0)))
        return call(xb, *consts)[:B]

    return jax.jit(fwd)


# ----------------------------------------------------------------------------
# deterministic parameter init (mirrors PoolSelector.__init__ shapes)
# ----------------------------------------------------------------------------
def init_params(key, m_size, in_channels):
    side = int(m_size ** (1.0 / 3.0))
    new_size = side ** 3

    dims = []
    ns = new_size
    while ns >= 2:
        dn = ns // 2
        last = dn == 1
        dims.append((ns, dn, last))
        if last:
            break
        ns = dn

    keys = iter(jax.random.split(key, 2 + 5 * len(dims)))
    wconv = 0.3 * jax.random.normal(next(keys), (side, in_channels), jnp.float32)
    bconv = 0.1 * jax.random.normal(next(keys), (side,), jnp.float32)
    blocks = []
    for (cin, cout, _) in dims:
        w = jax.random.normal(next(keys), (cout, cin), jnp.float32) / np.sqrt(cin)
        gamma = 1.0 + 0.1 * jax.random.normal(next(keys), (cout,), jnp.float32)
        beta = 0.1 * jax.random.normal(next(keys), (cout,), jnp.float32)
        rmean = 0.1 * jax.random.normal(next(keys), (cout,), jnp.float32)
        rvar = 0.9 + 0.2 * jax.random.uniform(next(keys), (cout,), jnp.float32)
        blocks.append(dict(w=w, gamma=gamma, beta=beta, rmean=rmean, rvar=rvar))

    return dict(side=side, dims=dims, wconv=wconv, bconv=bconv, blocks=blocks)


# ----------------------------------------------------------------------------
# pure-JAX reference (same semantics, f32 / HIGHEST precision)
# ----------------------------------------------------------------------------
def reference_forward(x, params, eps=1e-5):
    B, C, H, W = x.shape
    side = params["side"]
    pooled = x.reshape(B, C, side, H // side, side, W // side).mean(axis=(3, 5))
    conv = jnp.einsum("oc,bcij->boij", params["wconv"], pooled,
                      precision=lax.Precision.HIGHEST)
    conv = conv + params["bconv"][None, :, None, None]
    cur = conv.reshape(B, side ** 3)
    for blk, (cin, cout, last) in zip(params["blocks"], params["dims"]):
        x_l = jnp.dot(cur, blk["w"].T, precision=lax.Precision.HIGHEST)
        x_bn = (x_l - blk["rmean"]) / jnp.sqrt(blk["rvar"] + eps) * blk["gamma"] + blk["beta"]
        if last:
            cur = jax.nn.sigmoid(x_bn)
        else:
            P = jnp.asarray(adaptive_pool1d_matrix(cin, cout))
            x_p = jnp.dot(cur, P, precision=lax.Precision.HIGHEST)
            cur = x_bn * jnp.tanh(jax.nn.softplus(x_bn)) + x_p
    return cur


if __name__ == "__main__":
    m_size = 80            # side = int(80 ** (1/3)) = 4 -> flattened feature size 64
    B, C, H, W = 2, 4, 16, 16

    key = jax.random.PRNGKey(0)
    kx, kp = jax.random.split(key)
    x = jax.random.normal(kx, (B, C, H, W), jnp.float32)
    params = init_params(kp, m_size, C)

    try:
        fwd = build_pool_selector(params, x.shape)
        out = jax.block_until_ready(fwd(x))
    except Exception:
        # Fallback for jax versions that reject BlockSpec pipeline_mode /
        # pl.Buffered(1): identical kernel, constants just keep default buffering.
        fwd = build_pool_selector(params, x.shape, single_buffer_consts=False)
        out = jax.block_until_ready(fwd(x))
    assert out.shape == (B, 1)

    ref = reference_forward(x, params)
    # Tolerance deliberately covers bf16 operands (f32 MXU accumulation) and the
    # approx EUP reciprocals used for Mish/Sigmoid; observed error is ~1e-3.
    np.testing.assert_allclose(np.asarray(out), np.asarray(ref), rtol=2e-2, atol=2e-2)

    print("KERNEL_OK")
</pallas_src>

<mosaic_0001>
module attributes {stable_mosaic.version = 11 : i64} {
  func.func @kernel(%arg0: i32, %arg1: i32, %arg2: memref<2x1024xbf16, #tpu.memory_space<vmem>>, %arg3: memref<1024x64xbf16, #tpu.memory_space<vmem>>, %arg4: memref<1x64xf32, #tpu.memory_space<vmem>>, %arg5: memref<32x144xbf16, #tpu.memory_space<vmem>>, %arg6: memref<1x16xf32, #tpu.memory_space<vmem>>, %arg7: memref<16x136xbf16, #tpu.memory_space<vmem>>, %arg8: memref<1x8xf32, #tpu.memory_space<vmem>>, %arg9: memref<8x132xbf16, #tpu.memory_space<vmem>>, %arg10: memref<1x4xf32, #tpu.memory_space<vmem>>, %arg11: memref<4x130xbf16, #tpu.memory_space<vmem>>, %arg12: memref<1x2xf32, #tpu.memory_space<vmem>>, %arg13: memref<2x1xbf16, #tpu.memory_space<vmem>>, %arg14: memref<1x1xf32, #tpu.memory_space<vmem>>, %arg15: memref<2x1xf32, #tpu.memory_space<vmem>>, %arg16: memref<2x64xf32, #tpu.memory_space<vmem>>) attributes {dimension_semantics = [#tpu.dimension_semantics<parallel>, #tpu.dimension_semantics<arbitrary>], iteration_bounds = array<i64: 1, 1>, scalar_prefetch = 0 : i64, scratch_operands = 1 : i64, tpu.core_type = #tpu.core_type<tc>, window_params = [{transform_indices = @transform_0, window_bounds = array<i64: 2, 1024>}, {pipeline_mode = #tpu.pipeline_mode<synchronous>, transform_indices = @transform_1, window_bounds = array<i64: 1024, 64>}, {pipeline_mode = #tpu.pipeline_mode<synchronous>, transform_indices = @transform_2, window_bounds = array<i64: 1, 64>}, {pipeline_mode = #tpu.pipeline_mode<synchronous>, transform_indices = @transform_3, window_bounds = array<i64: 32, 144>}, {pipeline_mode = #tpu.pipeline_mode<synchronous>, transform_indices = @transform_4, window_bounds = array<i64: 1, 16>}, {pipeline_mode = #tpu.pipeline_mode<synchronous>, transform_indices = @transform_5, window_bounds = array<i64: 16, 136>}, {pipeline_mode = #tpu.pipeline_mode<synchronous>, transform_indices = @transform_6, window_bounds = array<i64: 1, 8>}, {pipeline_mode = #tpu.pipeline_mode<synchronous>, transform_indices = @transform_7, window_bounds = array<i64: 8, 132>}, {pipeline_mode = #tpu.pipeline_mode<synchronous>, transform_indices = @transform_8, window_bounds = array<i64: 1, 4>}, {pipeline_mode = #tpu.pipeline_mode<synchronous>, transform_indices = @transform_9, window_bounds = array<i64: 4, 130>}, {pipeline_mode = #tpu.pipeline_mode<synchronous>, transform_indices = @transform_10, window_bounds = array<i64: 1, 2>}, {pipeline_mode = #tpu.pipeline_mode<synchronous>, transform_indices = @transform_11, window_bounds = array<i64: 2, 1>}, {pipeline_mode = #tpu.pipeline_mode<synchronous>, transform_indices = @transform_12, window_bounds = array<i64: 1, 1>}, {transform_indices = @transform_13, window_bounds = array<i64: 2, 1>}]} {
    %c0_i32 = arith.constant 0 : i32
    %0 = arith.cmpi eq, %arg1, %c0_i32 : i32
    %1 = arith.extui %0 : i1 to i32
    %c0_i32_0 = arith.constant 0 : i32
    %2 = arith.cmpi ne, %1, %c0_i32_0 : i32
    scf.if %2 {
      %cst_10 = arith.constant 0.000000e+00 : f32
      %12 = vector.broadcast %cst_10 : f32 to vector<2x64xf32>
      %c0_11 = arith.constant 0 : index
      %c0_12 = arith.constant 0 : index
      %13 = vector.load %arg16[%c0_11, %c0_12] : memref<2x64xf32, #tpu.memory_space<vmem>>, vector<2x64xf32>
      tpu.vector_store %arg16[%c0_11, %c0_12], %12 {strides = array<i32>} : memref<2x64xf32, #tpu.memory_space<vmem>>, vector<2x64xf32>,
    } else {
    }
    %c0 = arith.constant 0 : index
    %c0_1 = arith.constant 0 : index
    %3 = vector.load %arg16[%c0, %c0_1] : memref<2x64xf32, #tpu.memory_space<vmem>>, vector<2x64xf32>
    %c0_2 = arith.constant 0 : index
    %c0_3 = arith.constant 0 : index
    %4 = vector.load %arg2[%c0_2, %c0_3] : memref<2x1024xbf16, #tpu.memory_space<vmem>>, vector<2x1024xbf16>
    %c0_4 = arith.constant 0 : index
    %c0_5 = arith.constant 0 : index
    %5 = vector.load %arg3[%c0_4, %c0_5] : memref<1024x64xbf16, #tpu.memory_space<vmem>>, vector<1024x64xbf16>
    %cst = arith.constant dense<0.000000e+00> : vector<2x64xf32>
    %6 = tpu.matmul %4, %5, %cst {dimension_numbers = #tpu.dot_dimension_numbers<[1], [0], [0], [1], [0, 0, 1, 1], [], []>} : vector<2x1024xbf16>, vector<1024x64xbf16>, vector<2x64xf32> -> vector<2x64xf32>
    %7 = arith.addf %3, %6 : vector<2x64xf32>
    %c0_6 = arith.constant 0 : index
    %c0_7 = arith.constant 0 : index
    %8 = vector.load %arg16[%c0_6, %c0_7] : memref<2x64xf32, #tpu.memory_space<vmem>>, vector<2x64xf32>
    tpu.vector_store %arg16[%c0_6, %c0_7], %7 {strides = array<i32>} : memref<2x64xf32, #tpu.memory_space<vmem>>, vector<2x64xf32>,
    %c0_i32_8 = arith.constant 0 : i32
    %9 = arith.cmpi eq, %arg1, %c0_i32_8 : i32
    %10 = arith.extui %9 : i1 to i32
    %c0_i32_9 = arith.constant 0 : i32
    %11 = arith.cmpi ne, %10, %c0_i32_9 : i32
    scf.if %11 {
      %c0_10 = arith.constant 0 : index
      %c0_11 = arith.constant 0 : index
      %12 = vector.load %arg16[%c0_10, %c0_11] : memref<2x64xf32, #tpu.memory_space<vmem>>, vector<2x64xf32>
      %c0_12 = arith.constant 0 : index
      %c0_13 = arith.constant 0 : index
      %13 = vector.load %arg4[%c0_12, %c0_13] : memref<1x64xf32, #tpu.memory_space<vmem>>, vector<1x64xf32>
      %14 = vector.broadcast %13 : vector<1x64xf32> to vector<2x64xf32>
      %15 = arith.addf %12, %14 : vector<2x64xf32>
      %16 = vector.extract_strided_slice %15 {offsets = [0, 0], sizes = [2, 32], strides = [1, 1]} : vector<2x64xf32> to vector<2x32xf32>
      %cst_14 = arith.constant 2.000000e+01 : f32
      %17 = vector.broadcast %cst_14 : f32 to vector<2x32xf32>
      %18 = arith.minimumf %16, %17 : vector<2x32xf32>
      %19 = math.exp %18 : vector<2x32xf32>
      %cst_15 = arith.constant 2.000000e+00 : f32
      %20 = vector.broadcast %cst_15 : f32 to vector<2x32xf32>
      %21 = arith.addf %19, %20 : vector<2x32xf32>
      %22 = arith.mulf %19, %21 : vector<2x32xf32>
      %cst_16 = arith.constant 2.000000e+00 : f32
      %23 = vector.broadcast %cst_16 : f32 to vector<2x32xf32>
      %24 = arith.addf %22, %23 : vector<2x32xf32>
      %25 = tpu.reciprocal %24 {approx = true} : vector<2x32xf32> -> vector<2x32xf32>
      %26 = arith.mulf %22, %25 : vector<2x32xf32>
      %27 = arith.mulf %16, %26 : vector<2x32xf32>
      %28 = vector.extract_strided_slice %15 {offsets = [0, 32], sizes = [2, 32], strides = [1, 1]} : vector<2x64xf32> to vector<2x32xf32>
      %29 = arith.addf %27, %28 : vector<2x32xf32>
      %c0_17 = arith.constant 0 : index
      %c0_18 = arith.constant 0 : index
      %30 = vector.load %arg5[%c0_17, %c0_18] : memref<32x144xbf16, #tpu.memory_space<vmem>>, vector<32x144xbf16>
      %cst_19 = arith.constant dense<0.000000e+00> : vector<2x144xf32>
      %31 = tpu.matmul %29, %30, %cst_19 {dimension_numbers = #tpu.dot_dimension_numbers<[1], [0], [0], [1], [0, 0, 1, 1], [], []>} : vector<2x32xf32>, vector<32x144xbf16>, vector<2x144xf32> -> vector<2x144xf32>
      %32 = vector.extract_strided_slice %31 {offsets = [0, 0], sizes = [2, 16], strides = [1, 1]} : vector<2x144xf32> to vector<2x16xf32>
      %c0_20 = arith.constant 0 : index
      %c0_21 = arith.constant 0 : index
      %33 = vector.load %arg6[%c0_20, %c0_21] : memref<1x16xf32, #tpu.memory_space<vmem>>, vector<1x16xf32>
      %34 = vector.broadcast %33 : vector<1x16xf32> to vector<2x16xf32>
      %35 = arith.addf %32, %34 : vector<2x16xf32>
      %cst_22 = arith.constant 2.000000e+01 : f32
      %36 = vector.broadcast %cst_22 : f32 to vector<2x16xf32>
      %37 = arith.minimumf %35, %36 : vector<2x16xf32>
      %38 = math.exp %37 : vector<2x16xf32>
      %cst_23 = arith.constant 2.000000e+00 : f32
      %39 = vector.broadcast %cst_23 : f32 to vector<2x16xf32>
      %40 = arith.addf %38, %39 : vector<2x16xf32>
      %41 = arith.mulf %38, %40 : vector<2x16xf32>
      %cst_24 = arith.constant 2.000000e+00 : f32
      %42 = vector.broadcast %cst_24 : f32 to vector<2x16xf32>
      %43 = arith.addf %41, %42 : vector<2x16xf32>
      %44 = tpu.reciprocal %43 {approx = true} : vector<2x16xf32> -> vector<2x16xf32>
      %45 = arith.mulf %41, %44 : vector<2x16xf32>
      %46 = arith.mulf %35, %45 : vector<2x16xf32>
      %47 = vector.extract_strided_slice %31 {offsets = [0, 128], sizes = [2, 16], strides = [1, 1]} : vector<2x144xf32> to vector<2x16xf32>
      %48 = arith.addf %46, %47 : vector<2x16xf32>
      %c0_25 = arith.constant 0 : index
      %c0_26 = arith.constant 0 : index
      %49 = vector.load %arg7[%c0_25, %c0_26] : memref<16x136xbf16, #tpu.memory_space<vmem>>, vector<16x136xbf16>
      %cst_27 = arith.constant dense<0.000000e+00> : vector<2x136xf32>
      %50 = tpu.matmul %48, %49, %cst_27 {dimension_numbers = #tpu.dot_dimension_numbers<[1], [0], [0], [1], [0, 0, 1, 1], [], []>} : vector<2x16xf32>, vector<16x136xbf16>, vector<2x136xf32> -> vector<2x136xf32>
      %51 = vector.extract_strided_slice %50 {offsets = [0, 0], sizes = [2, 8], strides = [1, 1]} : vector<2x136xf32> to vector<2x8xf32>
      %c0_28 = arith.constant 0 : index
      %c0_29 = arith.constant 0 : index
      %52 = vector.load %arg8[%c0_28, %c0_29] : memref<1x8xf32, #tpu.memory_space<vmem>>, vector<1x8xf32>
      %53 = vector.broadcast %52 : vector<1x8xf32> to vector<2x8xf32>
      %54 = arith.addf %51, %53 : vector<2x8xf32>
      %cst_30 = arith.constant 2.000000e+01 : f32
      %55 = vector.broadcast %cst_30 : f32 to vector<2x8xf32>
      %56 = arith.minimumf %54, %55 : vector<2x8xf32>
      %57 = math.exp %56 : vector<2x8xf32>
      %cst_31 = arith.constant 2.000000e+00 : f32
      %58 = vector.broadcast %cst_31 : f32 to vector<2x8xf32>
      %59 = arith.addf %57, %58 : vector<2x8xf32>
      %60 = arith.mulf %57, %59 : vector<2x8xf32>
      %cst_32 = arith.constant 2.000000e+00 : f32
      %61 = vector.broadcast %cst_32 : f32 to vector<2x8xf32>
      %62 = arith.addf %60, %61 : vector<2x8xf32>
      %63 = tpu.reciprocal %62 {approx = true} : vector<2x8xf32> -> vector<2x8xf32>
      %64 = arith.mulf %60, %63 : vector<2x8xf32>
      %65 = arith.mulf %54, %64 : vector<2x8xf32>
      %66 = vector.extract_strided_slice %50 {offsets = [0, 128], sizes = [2, 8], strides = [1, 1]} : vector<2x136xf32> to vector<2x8xf32>
      %67 = arith.addf %65, %66 : vector<2x8xf32>
      %c0_33 = arith.constant 0 : index
      %c0_34 = arith.constant 0 : index
      %68 = vector.load %arg9[%c0_33, %c0_34] : memref<8x132xbf16, #tpu.memory_space<vmem>>, vector<8x132xbf16>
      %cst_35 = arith.constant dense<0.000000e+00> : vector<2x132xf32>
      %69 = tpu.matmul %67, %68, %cst_35 {dimension_numbers = #tpu.dot_dimension_numbers<[1], [0], [0], [1], [0, 0, 1, 1], [], []>} : vector<2x8xf32>, vector<8x132xbf16>, vector<2x132xf32> -> vector<2x132xf32>
      %70 = vector.extract_strided_slice %69 {offsets = [0, 0], sizes = [2, 4], strides = [1, 1]} : vector<2x132xf32> to vector<2x4xf32>
      %c0_36 = arith.constant 0 : index
      %c0_37 = arith.constant 0 : index
      %71 = vector.load %arg10[%c0_36, %c0_37] : memref<1x4xf32, #tpu.memory_space<vmem>>, vector<1x4xf32>
      %72 = vector.broadcast %71 : vector<1x4xf32> to vector<2x4xf32>
      %73 = arith.addf %70, %72 : vector<2x4xf32>
      %cst_38 = arith.constant 2.000000e+01 : f32
      %74 = vector.broadcast %cst_38 : f32 to vector<2x4xf32>
      %75 = arith.minimumf %73, %74 : vector<2x4xf32>
      %76 = math.exp %75 : vector<2x4xf32>
      %cst_39 = arith.constant 2.000000e+00 : f32
      %77 = vector.broadcast %cst_39 : f32 to vector<2x4xf32>
      %78 = arith.addf %76, %77 : vector<2x4xf32>
      %79 = arith.mulf %76, %78 : vector<2x4xf32>
      %cst_40 = arith.constant 2.000000e+00 : f32
      %80 = vector.broadcast %cst_40 : f32 to vector<2x4xf32>
      %81 = arith.addf %79, %80 : vector<2x4xf32>
      %82 = tpu.reciprocal %81 {approx = true} : vector<2x4xf32> -> vector<2x4xf32>
      %83 = arith.mulf %79, %82 : vector<2x4xf32>
      %84 = arith.mulf %73, %83 : vector<2x4xf32>
      %85 = vector.extract_strided_slice %69 {offsets = [0, 128], sizes = [2, 4], strides = [1, 1]} : vector<2x132xf32> to vector<2x4xf32>
      %86 = arith.addf %84, %85 : vector<2x4xf32>
      %c0_41 = arith.constant 0 : index
      %c0_42 = arith.constant 0 : index
      %87 = vector.load %arg11[%c0_41, %c0_42] : memref<4x130xbf16, #tpu.memory_space<vmem>>, vector<4x130xbf16>
      %cst_43 = arith.constant dense<0.000000e+00> : vector<2x130xf32>
      %88 = tpu.matmul %86, %87, %cst_43 {dimension_numbers = #tpu.dot_dimension_numbers<[1], [0], [0], [1], [0, 0, 1, 1], [], []>} : vector<2x4xf32>, vector<4x130xbf16>, vector<2x130xf32> -> vector<2x130xf32>
      %89 = vector.extract_strided_slice %88 {offsets = [0, 0], sizes = [2, 2], strides = [1, 1]} : vector<2x130xf32> to vector<2x2xf32>
      %c0_44 = arith.constant 0 : index
      %c0_45 = arith.constant 0 : index
      %90 = vector.load %arg12[%c0_44, %c0_45] : memref<1x2xf32, #tpu.memory_space<vmem>>, vector<1x2xf32>
      %91 = vector.broadcast %90 : vector<1x2xf32> to vector<2x2xf32>
      %92 = arith.addf %89, %91 : vector<2x2xf32>
      %cst_46 = arith.constant 2.000000e+01 : f32
      %93 = vector.broadcast %cst_46 : f32 to vector<2x2xf32>
      %94 = arith.minimumf %92, %93 : vector<2x2xf32>
      %95 = math.exp %94 : vector<2x2xf32>
      %cst_47 = arith.constant 2.000000e+00 : f32
      %96 = vector.broadcast %cst_47 : f32 to vector<2x2xf32>
      %97 = arith.addf %95, %96 : vector<2x2xf32>
      %98 = arith.mulf %95, %97 : vector<2x2xf32>
      %cst_48 = arith.constant 2.000000e+00 : f32
      %99 = vector.broadcast %cst_48 : f32 to vector<2x2xf32>
      %100 = arith.addf %98, %99 : vector<2x2xf32>
      %101 = tpu.reciprocal %100 {approx = true} : vector<2x2xf32> -> vector<2x2xf32>
      %102 = arith.mulf %98, %101 : vector<2x2xf32>
      %103 = arith.mulf %92, %102 : vector<2x2xf32>
      %104 = vector.extract_strided_slice %88 {offsets = [0, 128], sizes = [2, 2], strides = [1, 1]} : vector<2x130xf32> to vector<2x2xf32>
      %105 = arith.addf %103, %104 : vector<2x2xf32>
      %c0_49 = arith.constant 0 : index
      %c0_50 = arith.constant 0 : index
      %106 = vector.load %arg13[%c0_49, %c0_50] : memref<2x1xbf16, #tpu.memory_space<vmem>>, vector<2x1xbf16>
      %cst_51 = arith.constant dense<0.000000e+00> : vector<2x1xf32>
      %107 = tpu.matmul %105, %106, %cst_51 {dimension_numbers = #tpu.dot_dimension_numbers<[1], [0], [0], [1], [0, 0, 1, 1], [], []>} : vector<2x2xf32>, vector<2x1xbf16>, vector<2x1xf32> -> vector<2x1xf32>
      %c0_52 = arith.constant 0 : index
      %c0_53 = arith.constant 0 : index
      %108 = vector.load %arg14[%c0_52, %c0_53] : memref<1x1xf32, #tpu.memory_space<vmem>>, vector<1x1xf32>
      %109 = vector.broadcast %108 : vector<1x1xf32> to vector<2x1xf32>
      %110 = arith.addf %107, %109 : vector<2x1xf32>
      %cst_54 = arith.constant 0.000000e+00 : f32
      %111 = vector.broadcast %cst_54 : f32 to vector<2x1xf32>
      %112 = arith.subf %111, %110 : vector<2x1xf32>
      %cst_55 = arith.constant 3.000000e+01 : f32
      %113 = vector.broadcast %cst_55 : f32 to vector<2x1xf32>
      %114 = arith.minimumf %112, %113 : vector<2x1xf32>
      %115 = math.exp %114 : vector<2x1xf32>
      %cst_56 = arith.constant 1.000000e+00 : f32
      %116 = vector.broadcast %cst_56 : f32 to vector<2x1xf32>
      %117 = arith.addf %116, %115 : vector<2x1xf32>
      %118 = tpu.reciprocal %117 {approx = true} : vector<2x1xf32> -> vector<2x1xf32>
      %c0_57 = arith.constant 0 : index
      %c0_58 = arith.constant 0 : index
      %119 = vector.load %arg15[%c0_57, %c0_58] : memref<2x1xf32, #tpu.memory_space<vmem>>, vector<2x1xf32>
      tpu.vector_store %arg15[%c0_57, %c0_58], %118 {strides = array<i32>} : memref<2x1xf32, #tpu.memory_space<vmem>>, vector<2x1xf32>,
    } else {
    }
    return
  }
  func.func @transform_0(%arg0: i32, %arg1: i32) -> (i32, i32) {
    %c0_i32 = arith.constant 0 : i32
    return %arg0, %arg1 : i32, i32
  }
  func.func @transform_1(%arg0: i32, %arg1: i32) -> (i32, i32) {
    %c0_i32 = arith.constant 0 : i32
    %c0_i32_0 = arith.constant 0 : i32
    %c0_i32_1 = arith.constant 0 : i32
    return %c0_i32, %c0_i32_0 : i32, i32
  }
  func.func @transform_2(%arg0: i32, %arg1: i32) -> (i32, i32) {
    %c0_i32 = arith.constant 0 : i32
    %c0_i32_0 = arith.constant 0 : i32
    %c0_i32_1 = arith.constant 0 : i32
    return %c0_i32, %c0_i32_0 : i32, i32
  }
  func.func @transform_3(%arg0: i32, %arg1: i32) -> (i32, i32) {
    %c0_i32 = arith.constant 0 : i32
    %c0_i32_0 = arith.constant 0 : i32
    %c0_i32_1 = arith.constant 0 : i32
    return %c0_i32, %c0_i32_0 : i32, i32
  }
  func.func @transform_4(%arg0: i32, %arg1: i32) -> (i32, i32) {
    %c0_i32 = arith.constant 0 : i32
    %c0_i32_0 = arith.constant 0 : i32
    %c0_i32_1 = arith.constant 0 : i32
    return %c0_i32, %c0_i32_0 : i32, i32
  }
  func.func @transform_5(%arg0: i32, %arg1: i32) -> (i32, i32) {
    %c0_i32 = arith.constant 0 : i32
    %c0_i32_0 = arith.constant 0 : i32
    %c0_i32_1 = arith.constant 0 : i32
    return %c0_i32, %c0_i32_0 : i32, i32
  }
  func.func @transform_6(%arg0: i32, %arg1: i32) -> (i32, i32) {
    %c0_i32 = arith.constant 0 : i32
    %c0_i32_0 = arith.constant 0 : i32
    %c0_i32_1 = arith.constant 0 : i32
    return %c0_i32, %c0_i32_0 : i32, i32
  }
  func.func @transform_7(%arg0: i32, %arg1: i32) -> (i32, i32) {
    %c0_i32 = arith.constant 0 : i32
    %c0_i32_0 = arith.constant 0 : i32
    %c0_i32_1 = arith.constant 0 : i32
    return %c0_i32, %c0_i32_0 : i32, i32
  }
  func.func @transform_8(%arg0: i32, %arg1: i32) -> (i32, i32) {
    %c0_i32 = arith.constant 0 : i32
    %c0_i32_0 = arith.constant 0 : i32
    %c0_i32_1 = arith.constant 0 : i32
    return %c0_i32, %c0_i32_0 : i32, i32
  }
  func.func @transform_9(%arg0: i32, %arg1: i32) -> (i32, i32) {
    %c0_i32 = arith.constant 0 : i32
    %c0_i32_0 = arith.constant 0 : i32
    %c0_i32_1 = arith.constant 0 : i32
    return %c0_i32, %c0_i32_0 : i32, i32
  }
  func.func @transform_10(%arg0: i32, %arg1: i32) -> (i32, i32) {
    %c0_i32 = arith.constant 0 : i32
    %c0_i32_0 = arith.constant 0 : i32
    %c0_i32_1 = arith.constant 0 : i32
    return %c0_i32, %c0_i32_0 : i32, i32
  }
  func.func @transform_11(%arg0: i32, %arg1: i32) -> (i32, i32) {
    %c0_i32 = arith.constant 0 : i32
    %c0_i32_0 = arith.constant 0 : i32
    %c0_i32_1 = arith.constant 0 : i32
    return %c0_i32, %c0_i32_0 : i32, i32
  }
  func.func @transform_12(%arg0: i32, %arg1: i32) -> (i32, i32) {
    %c0_i32 = arith.constant 0 : i32
    %c0_i32_0 = arith.constant 0 : i32
    %c0_i32_1 = arith.constant 0 : i32
    return %c0_i32, %c0_i32_0 : i32, i32
  }
  func.func @transform_13(%arg0: i32, %arg1: i32) -> (i32, i32) {
    %c0_i32 = arith.constant 0 : i32
    %c0_i32_0 = arith.constant 0 : i32
    return %arg0, %c0_i32 : i32, i32
  }
}

module attributes {stable_mosaic.version = 11 : i64} {
  func.func @kernel(%arg0: i32, %arg1: i32, %arg2: memref<2x1024xbf16, #tpu.memory_space<vmem>>, %arg3: memref<1024x64xbf16, #tpu.memory_space<vmem>>, %arg4: memref<1x64xf32, #tpu.memory_space<vmem>>, %arg5: memref<32x144xbf16, #tpu.memory_space<vmem>>, %arg6: memref<1x16xf32, #tpu.memory_space<vmem>>, %arg7: memref<16x136xbf16, #tpu.memory_space<vmem>>, %arg8: memref<1x8xf32, #tpu.memory_space<vmem>>, %arg9: memref<8x132xbf16, #tpu.memory_space<vmem>>, %arg10: memref<1x4xf32, #tpu.memory_space<vmem>>, %arg11: memref<4x130xbf16, #tpu.memory_space<vmem>>, %arg12: memref<1x2xf32, #tpu.memory_space<vmem>>, %arg13: memref<2x1xbf16, #tpu.memory_space<vmem>>, %arg14: memref<1x1xf32, #tpu.memory_space<vmem>>, %arg15: memref<2x1xf32, #tpu.memory_space<vmem>>, %arg16: memref<2x64xf32, #tpu.memory_space<vmem>>) attributes {dimension_semantics = [#tpu.dimension_semantics<parallel>, #tpu.dimension_semantics<arbitrary>], iteration_bounds = array<i64: 1, 1>, scalar_prefetch = 0 : i64, scratch_operands = 1 : i64, tpu.core_type = #tpu.core_type<tc>, window_params = [{transform_indices = @transform_0, window_bounds = array<i64: 2, 1024>}, {pipeline_mode = #tpu.pipeline_mode<synchronous>, transform_indices = @transform_1, window_bounds = array<i64: 1024, 64>}, {pipeline_mode = #tpu.pipeline_mode<synchronous>, transform_indices = @transform_2, window_bounds = array<i64: 1, 64>}, {pipeline_mode = #tpu.pipeline_mode<synchronous>, transform_indices = @transform_3, window_bounds = array<i64: 32, 144>}, {pipeline_mode = #tpu.pipeline_mode<synchronous>, transform_indices = @transform_4, window_bounds = array<i64: 1, 16>}, {pipeline_mode = #tpu.pipeline_mode<synchronous>, transform_indices = @transform_5, window_bounds = array<i64: 16, 136>}, {pipeline_mode = #tpu.pipeline_mode<synchronous>, transform_indices = @transform_6, window_bounds = array<i64: 1, 8>}, {pipeline_mode = #tpu.pipeline_mode<synchronous>, transform_indices = @transform_7, window_bounds = array<i64: 8, 132>}, {pipeline_mode = #tpu.pipeline_mode<synchronous>, transform_indices = @transform_8, window_bounds = array<i64: 1, 4>}, {pipeline_mode = #tpu.pipeline_mode<synchronous>, transform_indices = @transform_9, window_bounds = array<i64: 4, 130>}, {pipeline_mode = #tpu.pipeline_mode<synchronous>, transform_indices = @transform_10, window_bounds = array<i64: 1, 2>}, {pipeline_mode = #tpu.pipeline_mode<synchronous>, transform_indices = @transform_11, window_bounds = array<i64: 2, 1>}, {pipeline_mode = #tpu.pipeline_mode<synchronous>, transform_indices = @transform_12, window_bounds = array<i64: 1, 1>}, {transform_indices = @transform_13, window_bounds = array<i64: 2, 1>}]} {
    %c0_i32 = arith.constant 0 : i32
    %0 = arith.cmpi eq, %arg1, %c0_i32 : i32
    %1 = arith.extui %0 : i1 to i32
    %c0_i32_0 = arith.constant 0 : i32
    %2 = arith.cmpi ne, %1, %c0_i32_0 : i32
    scf.if %2 {
      %cst_10 = arith.constant 0.000000e+00 : f32
      %12 = vector.broadcast %cst_10 : f32 to vector<2x64xf32>
      %c0_11 = arith.constant 0 : index
      %c0_12 = arith.constant 0 : index
      %13 = vector.load %arg16[%c0_11, %c0_12] : memref<2x64xf32, #tpu.memory_space<vmem>>, vector<2x64xf32>
      tpu.vector_store %arg16[%c0_11, %c0_12], %12 {strides = array<i32>} : memref<2x64xf32, #tpu.memory_space<vmem>>, vector<2x64xf32>,
    } else {
    }
    %c0 = arith.constant 0 : index
    %c0_1 = arith.constant 0 : index
    %3 = vector.load %arg16[%c0, %c0_1] : memref<2x64xf32, #tpu.memory_space<vmem>>, vector<2x64xf32>
    %c0_2 = arith.constant 0 : index
    %c0_3 = arith.constant 0 : index
    %4 = vector.load %arg2[%c0_2, %c0_3] : memref<2x1024xbf16, #tpu.memory_space<vmem>>, vector<2x1024xbf16>
    %c0_4 = arith.constant 0 : index
    %c0_5 = arith.constant 0 : index
    %5 = vector.load %arg3[%c0_4, %c0_5] : memref<1024x64xbf16, #tpu.memory_space<vmem>>, vector<1024x64xbf16>
    %cst = arith.constant dense<0.000000e+00> : vector<2x64xf32>
    %6 = tpu.matmul %4, %5, %cst {dimension_numbers = #tpu.dot_dimension_numbers<[1], [0], [0], [1], [0, 0, 1, 1], [], []>} : vector<2x1024xbf16>, vector<1024x64xbf16>, vector<2x64xf32> -> vector<2x64xf32>
    %7 = arith.addf %3, %6 : vector<2x64xf32>
    %c0_6 = arith.constant 0 : index
    %c0_7 = arith.constant 0 : index
    %8 = vector.load %arg16[%c0_6, %c0_7] : memref<2x64xf32, #tpu.memory_space<vmem>>, vector<2x64xf32>
    tpu.vector_store %arg16[%c0_6, %c0_7], %7 {strides = array<i32>} : memref<2x64xf32, #tpu.memory_space<vmem>>, vector<2x64xf32>,
    %c0_i32_8 = arith.constant 0 : i32
    %9 = arith.cmpi eq, %arg1, %c0_i32_8 : i32
    %10 = arith.extui %9 : i1 to i32
    %c0_i32_9 = arith.constant 0 : i32
    %11 = arith.cmpi ne, %10, %c0_i32_9 : i32
    scf.if %11 {
      %c0_10 = arith.constant 0 : index
      %c0_11 = arith.constant 0 : index
      %12 = vector.load %arg16[%c0_10, %c0_11] : memref<2x64xf32, #tpu.memory_space<vmem>>, vector<2x64xf32>
      %c0_12 = arith.constant 0 : index
      %c0_13 = arith.constant 0 : index
      %13 = vector.load %arg4[%c0_12, %c0_13] : memref<1x64xf32, #tpu.memory_space<vmem>>, vector<1x64xf32>
      %14 = vector.broadcast %13 : vector<1x64xf32> to vector<2x64xf32>
      %15 = arith.addf %12, %14 : vector<2x64xf32>
      %16 = vector.extract_strided_slice %15 {offsets = [0, 0], sizes = [2, 32], strides = [1, 1]} : vector<2x64xf32> to vector<2x32xf32>
      %cst_14 = arith.constant 2.000000e+01 : f32
      %17 = vector.broadcast %cst_14 : f32 to vector<2x32xf32>
      %18 = arith.minimumf %16, %17 : vector<2x32xf32>
      %19 = math.exp %18 : vector<2x32xf32>
      %cst_15 = arith.constant 2.000000e+00 : f32
      %20 = vector.broadcast %cst_15 : f32 to vector<2x32xf32>
      %21 = arith.addf %19, %20 : vector<2x32xf32>
      %22 = arith.mulf %19, %21 : vector<2x32xf32>
      %cst_16 = arith.constant 2.000000e+00 : f32
      %23 = vector.broadcast %cst_16 : f32 to vector<2x32xf32>
      %24 = arith.addf %22, %23 : vector<2x32xf32>
      %25 = tpu.reciprocal %24 {approx = true} : vector<2x32xf32> -> vector<2x32xf32>
      %26 = arith.mulf %22, %25 : vector<2x32xf32>
      %27 = arith.mulf %16, %26 : vector<2x32xf32>
      %28 = vector.extract_strided_slice %15 {offsets = [0, 32], sizes = [2, 32], strides = [1, 1]} : vector<2x64xf32> to vector<2x32xf32>
      %29 = arith.addf %27, %28 : vector<2x32xf32>
      %c0_17 = arith.constant 0 : index
      %c0_18 = arith.constant 0 : index
      %30 = vector.load %arg5[%c0_17, %c0_18] : memref<32x144xbf16, #tpu.memory_space<vmem>>, vector<32x144xbf16>
      %cst_19 = arith.constant dense<0.000000e+00> : vector<2x144xf32>
      %31 = tpu.matmul %29, %30, %cst_19 {dimension_numbers = #tpu.dot_dimension_numbers<[1], [0], [0], [1], [0, 0, 1, 1], [], []>} : vector<2x32xf32>, vector<32x144xbf16>, vector<2x144xf32> -> vector<2x144xf32>
      %32 = vector.extract_strided_slice %31 {offsets = [0, 0], sizes = [2, 16], strides = [1, 1]} : vector<2x144xf32> to vector<2x16xf32>
      %c0_20 = arith.constant 0 : index
      %c0_21 = arith.constant 0 : index
      %33 = vector.load %arg6[%c0_20, %c0_21] : memref<1x16xf32, #tpu.memory_space<vmem>>, vector<1x16xf32>
      %34 = vector.broadcast %33 : vector<1x16xf32> to vector<2x16xf32>
      %35 = arith.addf %32, %34 : vector<2x16xf32>
      %cst_22 = arith.constant 2.000000e+01 : f32
      %36 = vector.broadcast %cst_22 : f32 to vector<2x16xf32>
      %37 = arith.minimumf %35, %36 : vector<2x16xf32>
      %38 = math.exp %37 : vector<2x16xf32>
      %cst_23 = arith.constant 2.000000e+00 : f32
      %39 = vector.broadcast %cst_23 : f32 to vector<2x16xf32>
      %40 = arith.addf %38, %39 : vector<2x16xf32>
      %41 = arith.mulf %38, %40 : vector<2x16xf32>
      %cst_24 = arith.constant 2.000000e+00 : f32
      %42 = vector.broadcast %cst_24 : f32 to vector<2x16xf32>
      %43 = arith.addf %41, %42 : vector<2x16xf32>
      %44 = tpu.reciprocal %43 {approx = true} : vector<2x16xf32> -> vector<2x16xf32>
      %45 = arith.mulf %41, %44 : vector<2x16xf32>
      %46 = arith.mulf %35, %45 : vector<2x16xf32>
      %47 = vector.extract_strided_slice %31 {offsets = [0, 128], sizes = [2, 16], strides = [1, 1]} : vector<2x144xf32> to vector<2x16xf32>
      %48 = arith.addf %46, %47 : vector<2x16xf32>
      %c0_25 = arith.constant 0 : index
      %c0_26 = arith.constant 0 : index
      %49 = vector.load %arg7[%c0_25, %c0_26] : memref<16x136xbf16, #tpu.memory_space<vmem>>, vector<16x136xbf16>
      %cst_27 = arith.constant dense<0.000000e+00> : vector<2x136xf32>
      %50 = tpu.matmul %48, %49, %cst_27 {dimension_numbers = #tpu.dot_dimension_numbers<[1], [0], [0], [1], [0, 0, 1, 1], [], []>} : vector<2x16xf32>, vector<16x136xbf16>, vector<2x136xf32> -> vector<2x136xf32>
      %51 = vector.extract_strided_slice %50 {offsets = [0, 0], sizes = [2, 8], strides = [1, 1]} : vector<2x136xf32> to vector<2x8xf32>
      %c0_28 = arith.constant 0 : index
      %c0_29 = arith.constant 0 : index
      %52 = vector.load %arg8[%c0_28, %c0_29] : memref<1x8xf32, #tpu.memory_space<vmem>>, vector<1x8xf32>
      %53 = vector.broadcast %52 : vector<1x8xf32> to vector<2x8xf32>
      %54 = arith.addf %51, %53 : vector<2x8xf32>
      %cst_30 = arith.constant 2.000000e+01 : f32
      %55 = vector.broadcast %cst_30 : f32 to vector<2x8xf32>
      %56 = arith.minimumf %54, %55 : vector<2x8xf32>
      %57 = math.exp %56 : vector<2x8xf32>
      %cst_31 = arith.constant 2.000000e+00 : f32
      %58 = vector.broadcast %cst_31 : f32 to vector<2x8xf32>
      %59 = arith.addf %57, %58 : vector<2x8xf32>
      %60 = arith.mulf %57, %59 : vector<2x8xf32>
      %cst_32 = arith.constant 2.000000e+00 : f32
      %61 = vector.broadcast %cst_32 : f32 to vector<2x8xf32>
      %62 = arith.addf %60, %61 : vector<2x8xf32>
      %63 = tpu.reciprocal %62 {approx = true} : vector<2x8xf32> -> vector<2x8xf32>
      %64 = arith.mulf %60, %63 : vector<2x8xf32>
      %65 = arith.mulf %54, %64 : vector<2x8xf32>
      %66 = vector.extract_strided_slice %50 {offsets = [0, 128], sizes = [2, 8], strides = [1, 1]} : vector<2x136xf32> to vector<2x8xf32>
      %67 = arith.addf %65, %66 : vector<2x8xf32>
      %c0_33 = arith.constant 0 : index
      %c0_34 = arith.constant 0 : index
      %68 = vector.load %arg9[%c0_33, %c0_34] : memref<8x132xbf16, #tpu.memory_space<vmem>>, vector<8x132xbf16>
      %cst_35 = arith.constant dense<0.000000e+00> : vector<2x132xf32>
      %69 = tpu.matmul %67, %68, %cst_35 {dimension_numbers = #tpu.dot_dimension_numbers<[1], [0], [0], [1], [0, 0, 1, 1], [], []>} : vector<2x8xf32>, vector<8x132xbf16>, vector<2x132xf32> -> vector<2x132xf32>
      %70 = vector.extract_strided_slice %69 {offsets = [0, 0], sizes = [2, 4], strides = [1, 1]} : vector<2x132xf32> to vector<2x4xf32>
      %c0_36 = arith.constant 0 : index
      %c0_37 = arith.constant 0 : index
      %71 = vector.load %arg10[%c0_36, %c0_37] : memref<1x4xf32, #tpu.memory_space<vmem>>, vector<1x4xf32>
      %72 = vector.broadcast %71 : vector<1x4xf32> to vector<2x4xf32>
      %73 = arith.addf %70, %72 : vector<2x4xf32>
      %cst_38 = arith.constant 2.000000e+01 : f32
      %74 = vector.broadcast %cst_38 : f32 to vector<2x4xf32>
      %75 = arith.minimumf %73, %74 : vector<2x4xf32>
      %76 = math.exp %75 : vector<2x4xf32>
      %cst_39 = arith.constant 2.000000e+00 : f32
      %77 = vector.broadcast %cst_39 : f32 to vector<2x4xf32>
      %78 = arith.addf %76, %77 : vector<2x4xf32>
      %79 = arith.mulf %76, %78 : vector<2x4xf32>
      %cst_40 = arith.constant 2.000000e+00 : f32
      %80 = vector.broadcast %cst_40 : f32 to vector<2x4xf32>
      %81 = arith.addf %79, %80 : vector<2x4xf32>
      %82 = tpu.reciprocal %81 {approx = true} : vector<2x4xf32> -> vector<2x4xf32>
      %83 = arith.mulf %79, %82 : vector<2x4xf32>
      %84 = arith.mulf %73, %83 : vector<2x4xf32>
      %85 = vector.extract_strided_slice %69 {offsets = [0, 128], sizes = [2, 4], strides = [1, 1]} : vector<2x132xf32> to vector<2x4xf32>
      %86 = arith.addf %84, %85 : vector<2x4xf32>
      %c0_41 = arith.constant 0 : index
      %c0_42 = arith.constant 0 : index
      %87 = vector.load %arg11[%c0_41, %c0_42] : memref<4x130xbf16, #tpu.memory_space<vmem>>, vector<4x130xbf16>
      %cst_43 = arith.constant dense<0.000000e+00> : vector<2x130xf32>
      %88 = tpu.matmul %86, %87, %cst_43 {dimension_numbers = #tpu.dot_dimension_numbers<[1], [0], [0], [1], [0, 0, 1, 1], [], []>} : vector<2x4xf32>, vector<4x130xbf16>, vector<2x130xf32> -> vector<2x130xf32>
      %89 = vector.extract_strided_slice %88 {offsets = [0, 0], sizes = [2, 2], strides = [1, 1]} : vector<2x130xf32> to vector<2x2xf32>
      %c0_44 = arith.constant 0 : index
      %c0_45 = arith.constant 0 : index
      %90 = vector.load %arg12[%c0_44, %c0_45] : memref<1x2xf32, #tpu.memory_space<vmem>>, vector<1x2xf32>
      %91 = vector.broadcast %90 : vector<1x2xf32> to vector<2x2xf32>
      %92 = arith.addf %89, %91 : vector<2x2xf32>
      %cst_46 = arith.constant 2.000000e+01 : f32
      %93 = vector.broadcast %cst_46 : f32 to vector<2x2xf32>
      %94 = arith.minimumf %92, %93 : vector<2x2xf32>
      %95 = math.exp %94 : vector<2x2xf32>
      %cst_47 = arith.constant 2.000000e+00 : f32
      %96 = vector.broadcast %cst_47 : f32 to vector<2x2xf32>
      %97 = arith.addf %95, %96 : vector<2x2xf32>
      %98 = arith.mulf %95, %97 : vector<2x2xf32>
      %cst_48 = arith.constant 2.000000e+00 : f32
      %99 = vector.broadcast %cst_48 : f32 to vector<2x2xf32>
      %100 = arith.addf %98, %99 : vector<2x2xf32>
      %101 = tpu.reciprocal %100 {approx = true} : vector<2x2xf32> -> vector<2x2xf32>
      %102 = arith.mulf %98, %101 : vector<2x2xf32>
      %103 = arith.mulf %92, %102 : vector<2x2xf32>
      %104 = vector.extract_strided_slice %88 {offsets = [0, 128], sizes = [2, 2], strides = [1, 1]} : vector<2x130xf32> to vector<2x2xf32>
      %105 = arith.addf %103, %104 : vector<2x2xf32>
      %c0_49 = arith.constant 0 : index
      %c0_50 = arith.constant 0 : index
      %106 = vector.load %arg13[%c0_49, %c0_50] : memref<2x1xbf16, #tpu.memory_space<vmem>>, vector<2x1xbf16>
      %cst_51 = arith.constant dense<0.000000e+00> : vector<2x1xf32>
      %107 = tpu.matmul %105, %106, %cst_51 {dimension_numbers = #tpu.dot_dimension_numbers<[1], [0], [0], [1], [0, 0, 1, 1], [], []>} : vector<2x2xf32>, vector<2x1xbf16>, vector<2x1xf32> -> vector<2x1xf32>
      %c0_52 = arith.constant 0 : index
      %c0_53 = arith.constant 0 : index
      %108 = vector.load %arg14[%c0_52, %c0_53] : memref<1x1xf32, #tpu.memory_space<vmem>>, vector<1x1xf32>
      %109 = vector.broadcast %108 : vector<1x1xf32> to vector<2x1xf32>
      %110 = arith.addf %107, %109 : vector<2x1xf32>
      %cst_54 = arith.constant 0.000000e+00 : f32
      %111 = vector.broadcast %cst_54 : f32 to vector<2x1xf32>
      %112 = arith.subf %111, %110 : vector<2x1xf32>
      %cst_55 = arith.constant 3.000000e+01 : f32
      %113 = vector.broadcast %cst_55 : f32 to vector<2x1xf32>
      %114 = arith.minimumf %112, %113 : vector<2x1xf32>
      %115 = math.exp %114 : vector<2x1xf32>
      %cst_56 = arith.constant 1.000000e+00 : f32
      %116 = vector.broadcast %cst_56 : f32 to vector<2x1xf32>
      %117 = arith.addf %116, %115 : vector<2x1xf32>
      %118 = tpu.reciprocal %117 {approx = true} : vector<2x1xf32> -> vector<2x1xf32>
      %c0_57 = arith.constant 0 : index
      %c0_58 = arith.constant 0 : index
      %119 = vector.load %arg15[%c0_57, %c0_58] : memref<2x1xf32, #tpu.memory_space<vmem>>, vector<2x1xf32>
      tpu.vector_store %arg15[%c0_57, %c0_58], %118 {strides = array<i32>} : memref<2x1xf32, #tpu.memory_space<vmem>>, vector<2x1xf32>,
    } else {
    }
    return
  }
  func.func @transform_0(%arg0: i32, %arg1: i32) -> (i32, i32) {
    %c0_i32 = arith.constant 0 : i32
    return %arg0, %arg1 : i32, i32
  }
  func.func @transform_1(%arg0: i32, %arg1: i32) -> (i32, i32) {
    %c0_i32 = arith.constant 0 : i32
    %c0_i32_0 = arith.constant 0 : i32
    %c0_i32_1 = arith.constant 0 : i32
    return %c0_i32, %c0_i32_0 : i32, i32
  }
  func.func @transform_2(%arg0: i32, %arg1: i32) -> (i32, i32) {
    %c0_i32 = arith.constant 0 : i32
    %c0_i32_0 = arith.constant 0 : i32
    %c0_i32_1 = arith.constant 0 : i32
    return %c0_i32, %c0_i32_0 : i32, i32
  }
  func.func @transform_3(%arg0: i32, %arg1: i32) -> (i32, i32) {
    %c0_i32 = arith.constant 0 : i32
    %c0_i32_0 = arith.constant 0 : i32
    %c0_i32_1 = arith.constant 0 : i32
    return %c0_i32, %c0_i32_0 : i32, i32
  }
  func.func @transform_4(%arg0: i32, %arg1: i32) -> (i32, i32) {
    %c0_i32 = arith.constant 0 : i32
    %c0_i32_0 = arith.constant 0 : i32
    %c0_i32_1 = arith.constant 0 : i32
    return %c0_i32, %c0_i32_0 : i32, i32
  }
  func.func @transform_5(%arg0: i32, %arg1: i32) -> (i32, i32) {
    %c0_i32 = arith.constant 0 : i32
    %c0_i32_0 = arith.constant 0 : i32
    %c0_i32_1 = arith.constant 0 : i32
    return %c0_i32, %c0_i32_0 : i32, i32
  }
  func.func @transform_6(%arg0: i32, %arg1: i32) -> (i32, i32) {
    %c0_i32 = arith.constant 0 : i32
    %c0_i32_0 = arith.constant 0 : i32
    %c0_i32_1 = arith.constant 0 : i32
    return %c0_i32, %c0_i32_0 : i32, i32
  }
  func.func @transform_7(%arg0: i32, %arg1: i32) -> (i32, i32) {
    %c0_i32 = arith.constant 0 : i32
    %c0_i32_0 = arith.constant 0 : i32
    %c0_i32_1 = arith.constant 0 : i32
    return %c0_i32, %c0_i32_0 : i32, i32
  }
  func.func @transform_8(%arg0: i32, %arg1: i32) -> (i32, i32) {
    %c0_i32 = arith.constant 0 : i32
    %c0_i32_0 = arith.constant 0 : i32
    %c0_i32_1 = arith.constant 0 : i32
    return %c0_i32, %c0_i32_0 : i32, i32
  }
  func.func @transform_9(%arg0: i32, %arg1: i32) -> (i32, i32) {
    %c0_i32 = arith.constant 0 : i32
    %c0_i32_0 = arith.constant 0 : i32
    %c0_i32_1 = arith.constant 0 : i32
    return %c0_i32, %c0_i32_0 : i32, i32
  }
  func.func @transform_10(%arg0: i32, %arg1: i32) -> (i32, i32) {
    %c0_i32 = arith.constant 0 : i32
    %c0_i32_0 = arith.constant 0 : i32
    %c0_i32_1 = arith.constant 0 : i32
    return %c0_i32, %c0_i32_0 : i32, i32
  }
  func.func @transform_11(%arg0: i32, %arg1: i32) -> (i32, i32) {
    %c0_i32 = arith.constant 0 : i32
    %c0_i32_0 = arith.constant 0 : i32
    %c0_i32_1 = arith.constant 0 : i32
    return %c0_i32, %c0_i32_0 : i32, i32
  }
  func.func @transform_12(%arg0: i32, %arg1: i32) -> (i32, i32) {
    %c0_i32 = arith.constant 0 : i32
    %c0_i32_0 = arith.constant 0 : i32
    %c0_i32_1 = arith.constant 0 : i32
    return %c0_i32, %c0_i32_0 : i32, i32
  }
  func.func @transform_13(%arg0: i32, %arg1: i32) -> (i32, i32) {
    %c0_i32 = arith.constant 0 : i32
    %c0_i32_0 = arith.constant 0 : i32
    return %arg0, %c0_i32 : i32, i32
  }
}

</mosaic_0001>

<bundles_post_ra>
// kernel: fwd.1
= control target key start
LH: loop header
LB: loop body
LE: loop exit
PB: predicated region body
PF: predicated region fallthrough
CT: control target
= control target key end

     0   :  { %s1679_s0 = inlined_call_operand.vmem [shape: bf16[2,1024], index: 0, kind: input, shape index: {}]   ;;  %s1680_s1 = inlined_call_operand.hbm [shape: bf16[1024,64], index: 1, kind: input, shape index: {}]   ;;  %s1681_s2 = inlined_call_operand.vmem [shape: f32[1,64], index: 2, kind: input, shape index: {}]   ;;  %s1682_s3 = inlined_call_operand.vmem [shape: bf16[32,144], index: 3, kind: input, shape index: {}]   ;;  %s1683_s4 = inlined_call_operand.vmem [shape: f32[1,16], index: 4, kind: input, shape index: {}]   ;;  %s1684_s5 = inlined_call_operand.vmem [shape: bf16[16,136], index: 5, kind: input, shape index: {}]   ;;  %s1685_s6 = inlined_call_operand.vmem [shape: f32[1,8], index: 6, kind: input, shape index: {}]   ;;  %s1686_s7 = inlined_call_operand.vmem [shape: bf16[8,132], index: 7, kind: input, shape index: {}]   ;;  %s1687_s8 = inlined_call_operand.vmem [shape: f32[1,4], index: 8, kind: input, shape index: {}]   ;;  %s1688_s9 = inlined_call_operand.vmem [shape: bf16[4,130], index: 9, kind: input, shape index: {}]   ;;  %s1689_s10 = inlined_call_operand.vmem [shape: f32[1,2], index: 10, kind: input, shape index: {}]   ;;  %s1690_s11 = inlined_call_operand.vmem [shape: bf16[2,1], index: 11, kind: input, shape index: {}]   ;;  %s1691_s12 = inlined_call_operand.<no memory space> [shape: f32[1,1], index: 12, kind: input, shape index: {}]   ;;  %s1692_s13 = inlined_call_operand.vmem [shape: f32[2,1], index: 13, kind: output, shape index: {}]  }
   0x1   :  { %v18_v0 = vstv %s1691_s12 }
   0x2   :  { %19 = vst [vmem:[#allocation3] sm:$0x1] %v18_v0 }
   0x3   :  { %20 = vsyncpa [#allocation5], 0  ;;  %s1517_s27 = smov [#allocation4]   ;;  %s1493_s14 = scalar_lea.hbm %s1680_s1, 8192 }
   0x4   :  { %s28_s28 = sshll.u32 %s1517_s27, 4  ;;  %p1494_p0 = scmp.ne.s32.totalorder %s1680_s1, %s1493_s14  ;;  %s29_s28 = int_to_ptr.vmem [resolvable:$true] %s28_s28 }
   0x5   :  { %p1497_p1 = scmp.lt.u32.totalorder %s1493_s14, %s1680_s1 }
   0x7   :  { %p1499_p2 = pnand %p1497_p1, %p1494_p0 }
   0x9   :  { %1502 = shalt.err (!%p1499_p2)
}
   0xa   :  { %s1503_s12 = scalar_lea.vmem %s29_s28, 8192  ;;  %p1508_p4 = scmp.lt.s32.totalorder %s29_s28, %s29_s28 }
   0xb   :  { %p1504_p3 = scmp.ne.s32.totalorder %s29_s28, %s1503_s12  ;;  %p1509_p5 = scmp.lt.s32.totalorder %s1503_s12, %s1503_s12 }
   0xd   :  { %p1510_p6 = por %p1509_p5, %p1508_p4 }
   0xf   :  { %p1511_p7 = pnand %p1510_p6, %p1504_p3 }
  0x11   :  { %1514 = shalt.err (!%p1511_p7)
}
  0x12   :  { %s1518_s19 = smov 64   ;;  %s1519_s20 = smov 4  }
  0x13   :  { %34 = dma.hbm_to_vmem [thread:$0]  %s1680_s1, 8192, %s29_s28, [#allocation5], %s1518_s19, %s1518_s19, %s1519_s20  }
  0x14   :  { %1515 = dma.done.wait [#allocation5], 8192  }
  0x15   :  { %1516 = vsyncadd [#allocation5], 4294959104  ;;  %v1393_v1 = vld [vmem:[#allocation4 + $0x40] sm:$0xff]   ;;  %v1397_v5 = vld [vmem:[#allocation4 + $0x48] sm:$0xff]   ;;  %v1520_v23 = vmov 1966171168   ;;  %v202_v25 = vlaneseq }
  0x16   :  { %v1394_v2 = vld [vmem:[#allocation4 + $0xc0] sm:$0xff]   ;;  %1291 = vmatprep.subr.bf16.mxu0 %v1393_v1  ;;  %v1398_v6 = vld [vmem:[#allocation4 + $0xc8] sm:$0xff]   ;;  %v1401_v9 = vld [vmem:[#allocation4 + $0x50] sm:$0xff]   ;;  %v200_v24 = vunpack.c.l.s4 %v1520_v23  ;;  %vm65_vm0 = vcmask 517120   ;;  %s1522_s15 = smov 96   ;;  %vm852_vm1 = vcmask 261120  }
  0x17   :  { %v1395_v3 = vld [vmem:[#allocation4] sm:$0xff]   ;;  %1313 = vmatprep.subr.bf16.mxu1 %v1394_v2  ;;  %v1399_v7 = vld [vmem:[#allocation4 + $0x8] sm:$0xff]   ;;  %v1402_v10 = vld [vmem:[#allocation4 + $0xd0] sm:$0xff]   ;;  %v203_v31 = vshrl.u32 %v202_v25, 7  ;;  %vm925_vm2 = vcmask 130048   ;;  %vm996_vm3 = vcmask 1043456  }
  0x18   :  { %v1396_v4 = vld [vmem:[#allocation4 + $0x80] sm:$0xff]   ;;  %1292 = vmatpush3.bf16.msra.mxu0 %v1395_v3  ;;  %v1400_v8 = vld [vmem:[#allocation4 + $0x88] sm:$0xff]   ;;  %v1403_v11 = vld [vmem:[#allocation4 + $0x10] sm:$0xff]   ;;  %v201_v30 = vunpack.c.0.s8 %v200_v24  ;;  %vm992_vm4 = vcmask 64512   ;;  %vm1074_vm5 = vcmask 1041408   ;;  %vm1070_vm6 = vcmask 31744  }
  0x19   :  { %1314 = vmatpush3.bf16.msra.mxu1 %v1396_v4  ;;  %1293 = vmatprep.subr.bf16.mxu0 %v1397_v5  ;;  %v1404_v12 = vld [vmem:[#allocation4 + $0x90] sm:$0xff]   ;;  %v1405_v13 = vld [vmem:[#allocation4 + $0x58] sm:$0xff]   ;;  %v1409_v17 = vld [vmem:[#allocation4 + $0x60] sm:$0xff]   ;;  %vm1150_vm7 = vcmask 1040384   ;;  %vm1523_vm8 = vmmov 0   ;;  %vm1146_vm9 = vcmask 15360  }
  0x1a   :  { %1315 = vmatprep.subr.bf16.mxu1 %v1398_v6  ;;  %v1406_v14 = vld [vmem:[#allocation4 + $0xd8] sm:$0xff]   ;;  %v1410_v18 = vld [vmem:[#allocation4 + $0xe0] sm:$0xff]   ;;  %v1413_v21 = vld [vmem:[#allocation4 + $0x68] sm:$0xff]   ;;  %v1609_v36 = vsub.s32 %v201_v30, %v203_v31  ;;  %vm1198_vm10 = vcmask 1024  }
  0x1b   :  { %v1407_v15 = vld [vmem:[#allocation4 + $0x18] sm:$0xff]   ;;  %v1411_v19 = vld [vmem:[#allocation4 + $0x20] sm:$0xff]   ;;  %v1414_v22 = vld [vmem:[#allocation4 + $0xe8] sm:$0xff]  }
  0x1c   :  { %1294 = vmatpush3.bf16.msra.mxu0 %v1399_v7  ;;  %v1408_v16 = vld [vmem:[#allocation4 + $0x98] sm:$0xff]   ;;  %v1412_v20 = vld [vmem:[#allocation4 + $0xa0] sm:$0xff]   ;;  %v1415_v26 = vld [vmem:[#allocation4 + $0x28] sm:$0xff]  }
  0x1d   :  { %1316 = vmatpush3.bf16.msra.mxu1 %v1400_v8  ;;  %1295 = vmatprep.subr.bf16.mxu0 %v1401_v9  ;;  %v1416_v27 = vld [vmem:[#allocation4 + $0xa8] sm:$0xff]   ;;  %v1417_v28 = vld [vmem:[#allocation4 + $0x70] sm:$0xff]   ;;  %v1421_v34 = vld [vmem:[#allocation4 + $0x78] sm:$0xff]  }
  0x1e   :  { %1317 = vmatprep.subr.bf16.mxu1 %v1402_v10  ;;  %v1418_v29 = vld [vmem:[#allocation4 + $0xf0] sm:$0xff]   ;;  %v1422_v35 = vld [vmem:[#allocation4 + $0xf8] sm:$0xff]   ;;  %v1426_v42 = vld [vmem:[#allocation4 + $0x140] sm:$0xff]  }
  0x1f   :  { %v1419_v32 = vld [vmem:[#allocation4 + $0x30] sm:$0xff]   ;;  %v1423_v37 = vld [vmem:[#allocation4 + $0x38] sm:$0xff]   ;;  %v1427_v43 = vld [vmem:[#allocation4 + $0x1c0] sm:$0xff]  }
  0x20   :  { %1296 = vmatpush3.bf16.msra.mxu0 %v1403_v11  ;;  %v1420_v33 = vld [vmem:[#allocation4 + $0xb0] sm:$0xff]   ;;  %v1424_v38 = vld [vmem:[#allocation4 + $0xb8] sm:$0xff]   ;;  %v1428_v47 = vld [vmem:[#allocation4 + $0x100] sm:$0xff]  }
  0x21   :  { %1318 = vmatpush3.bf16.msra.mxu1 %v1404_v12  ;;  %1297 = vmatprep.subr.bf16.mxu0 %v1405_v13  ;;  %v68_v39 = vld [vmem:[%s1679_s0] sm:$0xff]  ;;  %v1430_v52 = vld [vmem:[#allocation4 + $0x148] sm:$0xff]   ;;  %v1434_v59 = vld [vmem:[#allocation4 + $0x150] sm:$0xff]  }
  0x22   :  { %1319 = vmatprep.subr.bf16.mxu1 %v1406_v14  ;;  %v198_v40 = vcombine.high %v68_v39, %v68_v39  ;;  %v205_v41 = vrot.slane %v68_v39, %v1609_v36  ;;  %v1429_v49 = vld [vmem:[#allocation4 + $0x180] sm:$0xff]   ;;  %v1431_v54 = vld [vmem:[#allocation4 + $0x1c8] sm:$0xff]   ;;  %v1435_v60 = vld [vmem:[#allocation4 + $0x1d0] sm:$0xff]  }
  0x23   :  { %v1432_v56 = vld [vmem:[#allocation4 + $0x108] sm:$0xff]   ;;  %v1436_v61 = vld [vmem:[#allocation4 + $0x110] sm:$0xff]   ;;  %v1438_v63 = vld [vmem:[#allocation4 + $0x158] sm:$0xff]  }
  0x24   :  { %1298 = vmatpush3.bf16.msra.mxu0 %v1407_v15  ;;  %v213_v44 = vcombine.high %v205_v41, %v205_v41  ;;  %v221_v45 = vrot.slane %v205_v41, %v1609_v36  ;;  %v1617_v46 = vrot.slane %v198_v40, %v1609_v36  ;;  %v1433_v57 = vld [vmem:[#allocation4 + $0x188] sm:$0xff]   ;;  %v1437_v62 = vld [vmem:[#allocation4 + $0x190] sm:$0xff]   ;;  %v1439_v0 = vld [vmem:[#allocation4 + $0x1d8] sm:$0xff]  }
  0x25   :  { %1320 = vmatpush3.bf16.msra.mxu1 %v1408_v16  ;;  %1299 = vmatprep.subr.bf16.mxu0 %v1409_v17  ;;  %v1440_v1 = vld [vmem:[#allocation4 + $0x118] sm:$0xff]   ;;  %v1442_v3 = vld [vmem:[#allocation4 + $0x160] sm:$0xff]   ;;  %v1446_v7 = vld [vmem:[#allocation4 + $0x168] sm:$0xff]  }
  0x26   :  { %1321 = vmatprep.subr.bf16.mxu1 %v1410_v18  ;;  %v235_v48 = vrot.slane %v213_v44, %v1609_v36  ;;  %v214_v50 = vcombine.high %v1617_v46, %v1617_v46  ;;  %v243_v51 = vcombine.high %v221_v45, %v221_v45  ;;  %v1441_v2 = vld [vmem:[#allocation4 + $0x198] sm:$0xff]   ;;  %v1443_v4 = vld [vmem:[#allocation4 + $0x1e0] sm:$0xff]   ;;  %v1447_v8 = vld [vmem:[#allocation4 + $0x1e8] sm:$0xff]   ;;  %v228_v18 = vrot.slane %v1617_v46, %v1609_v36 }
  0x27   :  { %v1444_v5 = vld [vmem:[#allocation4 + $0x120] sm:$0xff]   ;;  %v1448_v9 = vld [vmem:[#allocation4 + $0x128] sm:$0xff]   ;;  %v1450_v11 = vld [vmem:[#allocation4 + $0x170] sm:$0xff]  }
  0x28   :  { %1300 = vmatpush3.bf16.msra.mxu0 %v1411_v19  ;;  %671 = vmatprep.mubr.bf16.mxu0 %v235_v48  ;;  %v245_v53 = vcombine.high %v235_v48, %v235_v48  ;;  %v242_v55 = vrot.slane %v214_v50, %v1609_v36  ;;  %v1445_v6 = vld [vmem:[#allocation4 + $0x1a0] sm:$0xff]   ;;  %v1449_v10 = vld [vmem:[#allocation4 + $0x1a8] sm:$0xff]   ;;  %v1451_v12 = vld [vmem:[#allocation4 + $0x1f0] sm:$0xff]  }
  0x29   :  { %1322 = vmatpush3.bf16.msra.mxu1 %v1412_v20  ;;  %1301 = vmatprep.subr.bf16.mxu0 %v1413_v21  ;;  %v1452_v13 = vld [vmem:[#allocation4 + $0x130] sm:$0xff]   ;;  %v1454_v15 = vld [vmem:[#allocation4 + $0x178] sm:$0xff]   ;;  %v244_v20 = vcombine.high %v228_v18, %v228_v18  ;;  %v1521_v21 = vmov 0.0   ;;  %v1460_v23 = vld [vmem:[%s1682_s3 + $0x4] ss:$8 sps:$4 sm:$0xff]  }
  0x2a   :  { %1323 = vmatprep.subr.bf16.mxu1 %v1414_v22  ;;  %711 = vmatprep.mubr.bf16.mxu1 %v245_v53  ;;  %v246_v58 = vcombine.high %v242_v55, %v242_v55  ;;  %v1453_v14 = vld [vmem:[#allocation4 + $0x1b0] sm:$0xff]   ;;  %v1455_v16 = vld [vmem:[#allocation4 + $0x1f8] sm:$0xff]   ;;  %66 = vst.msk [vmem:[#allocation2] sm:$0x3] %vm65_vm0, %v1521_v21 }
  0x2b   :  { %v1456_v17 = vld [vmem:[#allocation4 + $0x138] sm:$0xff]  }
  0x2c   :  { %1302 = vmatpush3.bf16.msra.mxu0 %v1415_v26  ;;  %v1457_v19 = vld [vmem:[#allocation4 + $0x1b8] sm:$0xff]  }
  0x2d   :  { %1324 = vmatpush3.bf16.msra.mxu1 %v1416_v27  ;;  %1303 = vmatprep.subr.bf16.mxu0 %v1417_v28  ;;  %v1458_v22 = vld [vmem:[%s1682_s3] ss:$8 sps:$4 sm:$0xff]   ;;  %v1463_v24 = vld [vmem:[%s1682_s3 + $0x14] ss:$8 sps:$4 sm:$0xff]   ;;  %v1461_v25 = vld [vmem:[%s1682_s3 + $0x10] ss:$8 sps:$4 sm:$0xff]  }
  0x2e   :  { %1325 = vmatprep.subr.bf16.mxu1 %v1418_v29 }
  0x30   :  { %1304 = vmatpush3.bf16.msra.mxu0 %v1419_v32 }
  0x31   :  { %1326 = vmatpush3.bf16.msra.mxu1 %v1420_v33  ;;  %1305 = vmatprep.subr.bf16.mxu0 %v1421_v34 }
  0x32   :  { %1327 = vmatprep.subr.bf16.mxu1 %v1422_v35 }
  0x34   :  { %1306 = vmatpush3.bf16.msra.mxu0 %v1423_v37 }
  0x35   :  { %1328 = vmatpush3.bf16.msra.mxu1 %v1424_v38  ;;  %1335 = vmatprep.subr.bf16.mxu0 %v1426_v42 }
  0x36   :  { %1357 = vmatprep.subr.bf16.mxu1 %v1427_v43 }
  0x37   :  { %672 = vmatmul.mubr.bf16.vlgmr.msra.gmra.mrb[0].mxu0 %v221_v45 }
  0x38   :  { %1336 = vmatpush3.bf16.msra.mxu0 %v1428_v47  ;;  %712 = vmatmul.mubr.bf16.vlgmr.msra.gmra.mrb[0].mxu1 %v243_v51  ;;  %v67_v47 = vld [vmem:[#allocation2] sm:$0x3] }
  0x39   :  { %1337 = vmatprep.subr.bf16.mxu0 %v1430_v52  ;;  %1358 = vmatpush3.bf16.msra.mxu1 %v1429_v49  ;;  %v1269_v51 = vld [vmem:[%s1681_s2] ss:$0 sm:$0xff] }
  0x3a   :  { %751 = vmatprep.mubr.bf16.mxu0 %v242_v55  ;;  %1359 = vmatprep.subr.bf16.mxu1 %v1431_v54 }
  0x3b   :  { %791 = vmatprep.mubr.bf16.mxu1 %v246_v58 }
  0x3c   :  { %1338 = vmatpush3.bf16.msra.mxu0 %v1432_v56 }
  0x3d   :  { %1339 = vmatprep.subr.bf16.mxu0 %v1434_v59  ;;  %1360 = vmatpush3.bf16.msra.mxu1 %v1433_v57 }
  0x3e   :  { %1361 = vmatprep.subr.bf16.mxu1 %v1435_v60 }
  0x40   :  { %1340 = vmatpush3.bf16.msra.mxu0 %v1436_v61 }
  0x41   :  { %1341 = vmatprep.subr.bf16.mxu0 %v1438_v63  ;;  %1362 = vmatpush3.bf16.msra.mxu1 %v1437_v62 }
  0x42   :  { %1363 = vmatprep.subr.bf16.mxu1 %v1439_v0 }
  0x44   :  { %1342 = vmatpush3.bf16.msra.mxu0 %v1440_v1  ;;  %v1466_v1 = vld [vmem:[%s1684_s5 + $0x4] ss:$8 sps:$4 sm:$0xff]  }
  0x45   :  { %1343 = vmatprep.subr.bf16.mxu0 %v1442_v3  ;;  %1364 = vmatpush3.bf16.msra.mxu1 %v1441_v2  ;;  %v1464_v2 = vld [vmem:[%s1684_s5] ss:$8 sps:$4 sm:$0xff]  }
  0x46   :  { %1365 = vmatprep.subr.bf16.mxu1 %v1443_v4  ;;  %v1275_v3 = vld [vmem:[%s1683_s4] ss:$0 sm:$0xff] }
  0x48   :  { %1344 = vmatpush3.bf16.msra.mxu0 %v1444_v5 }
  0x49   :  { %1345 = vmatprep.subr.bf16.mxu0 %v1446_v7  ;;  %1366 = vmatpush3.bf16.msra.mxu1 %v1445_v6 }
  0x4a   :  { %1367 = vmatprep.subr.bf16.mxu1 %v1447_v8 }
  0x4c   :  { %1346 = vmatpush3.bf16.msra.mxu0 %v1448_v9 }
  0x4d   :  { %1347 = vmatprep.subr.bf16.mxu0 %v1450_v11  ;;  %1368 = vmatpush3.bf16.msra.mxu1 %v1449_v10 }
  0x4e   :  { %1369 = vmatprep.subr.bf16.mxu1 %v1451_v12 }
  0x50   :  { %1348 = vmatpush3.bf16.msra.mxu0 %v1452_v13 }
  0x51   :  { %1349 = vmatprep.subr.bf16.mxu0 %v1454_v15  ;;  %1370 = vmatpush3.bf16.msra.mxu1 %v1453_v14 }
  0x52   :  { %1371 = vmatprep.subr.bf16.mxu1 %v1455_v16 }
  0x54   :  { %1350 = vmatpush3.bf16.msra.mxu0 %v1456_v17  ;;  %v986_v17 = vld [vmem:[%s1686_s7] sm:$0xff] }
  0x55   :  { %1372 = vmatpush3.bf16.msra.mxu1 %v1457_v19  ;;  %856 = vmatprep.subr.bf16.mxu0 %v1460_v23  ;;  %v1280_v19 = vcombine.low %v986_v17, %v986_v17 }
  0x56   :  { %929 = vmatprep.subr.bf16.mxu1 %v1466_v1 }
  0x57   :  { %752 = vmatmul.mubr.bf16.vlgmr.msra.gmra.mrb[4].mxu0 %v228_v18  ;;  %v1281_v18 = vcombine.high %v986_v17, %v986_v17 }
  0x58   :  { %792 = vmatmul.mubr.bf16.vlgmr.msra.gmra.mrb[4].mxu1 %v244_v20  ;;  %888 = vmatprep.mubr.f32.mxu0 %v1521_v21  ;;  %v998_v20 = vsel %vm996_vm3, %v1280_v19, 0 }
  0x59   :  { %961 = vmatprep.mubr.f32.mxu1 %v1521_v21  ;;  %857 = vmatpush1.bf16.msra.mxu0 %v1458_v22  ;;  %v1279_v22 = vld [vmem:[%s1685_s6] ss:$0 sm:$0xff] }
  0x5a   :  { %858 = vmatprep.subr.bf16.mxu0 %v1463_v24  ;;  %930 = vmatpush1.bf16.msra.mxu1 %v1464_v2 }
  0x5d   :  { %859 = vmatpush1.bf16.msra.mxu0 %v1461_v25 }
  0x5e   :  { %1282 = vmatprep.subr.msk.bf16.mxu0 %vm996_vm3, %v1281_v18 }
 0x10a   :  { %v1307_v26 = vpop.f32.mrb[0].mxu0 }
 0x10b   :  { %v1308_v27 = vpop.f32.mrb[1].mxu0  ;;  %v1329_v28 = vpop.f32.mrb[0].mxu1 }
 0x10c   :  { %v1309_v29 = vadd.f32 %v1308_v27, %v1307_v26  ;;  %v1310_v30 = vpop.f32.mrb[2].mxu0  ;;  %v1330_v31 = vpop.f32.mrb[1].mxu1 }
 0x10d   :  { %v1311_v32 = vpop.f32.mrb[3].mxu0  ;;  %v1331_v33 = vadd.f32 %v1330_v31, %v1329_v28  ;;  %v1332_v34 = vpop.f32.mrb[2].mxu1 }
 0x10e   :  { %v1333_v35 = vpop.f32.mrb[3].mxu1 }
 0x10f   :  { %v714_v36 = vadd.f32 %v1331_v33, %v1309_v29 }
 0x12a   :  { %v1351_v37 = vpop.f32.mrb[4].mxu0 }
 0x12b   :  { %v1352_v38 = vpop.f32.mrb[5].mxu0  ;;  %v1373_v39 = vpop.f32.mrb[4].mxu1 }
 0x12c   :  { %v1353_v40 = vadd.f32 %v1352_v38, %v1351_v37  ;;  %v1354_v41 = vpop.f32.mrb[6].mxu0  ;;  %v1374_v42 = vpop.f32.mrb[5].mxu1 }
 0x12d   :  { %v1355_v43 = vpop.f32.mrb[7].mxu0  ;;  %v1375_v45 = vadd.f32 %v1374_v42, %v1373_v39  ;;  %v1376_v46 = vpop.f32.mrb[6].mxu1  ;;  %v1284_v39 = vld [vmem:[%s1687_s8] ss:$0 sm:$0xff] }
 0x12e   :  { %v754_v44 = vadd.f32 %v1353_v40, %v714_v36  ;;  %v1377_v48 = vpop.f32.mrb[7].mxu1  ;;  %v1285_v36 = vld.sshfl [vmem:[%s1688_s9] sm:$0x33 pattern:$0x76325410] }
 0x12f   :  { %v1069_v37 = vcombine.high %v1285_v36, %v1285_v36  ;;  %v1076_v38 = vsel %vm1074_vm5, %v1285_v36, 0 }
 0x130   :  { %v794_v49 = vadd.f32 %v1375_v45, %v754_v44 }
 0x131   :  { %1286 = vmatprep.subr.msk.bf16.mxu1 %vm1074_vm5, %v1069_v37 }
 0x132   :  { %v799_v50 = vadd.f32 %v794_v49, %v67_v47 }
 0x134   :  { %801 = vst.msk [vmem:[#allocation2] sm:$0x3] %vm65_vm0, %v799_v50 }
 0x13b   :  { %v805_v52 = vld [vmem:[#allocation2] sm:$0x3] }
 0x13c   :  { %v813_v53 = vadd.f32 %v1269_v51, %v805_v52 }
 0x13e   :  { %824 = vrot.lane.b32.xlu0 %v813_v53, %s1522_s15  ;;  %v814_v54 = vmin.f32 %v813_v53, 20.0 }
 0x140   :  { %v815_v55 = vmul.f32 1.442695, %v814_v54 }
 0x142   :  { %1469 = vpow2.f32 %v815_v55  ;;  %v1288_v55 = vld [vmem:[%s1689_s10] ss:$0 sm:$0xff] }
 0x14c   :  { %v1470_v56 = vpop.eup %1469 }
 0x14d   :  { %v817_v57 = vadd.f32 2.0, %v1470_v56 }
 0x14f   :  { %v818_v58 = vmul.f32 %v1470_v56, %v817_v57 }
 0x151   :  { %v819_v59 = vadd.f32 2.0, %v818_v58 }
 0x153   :  { %1471 = vrcp.f32 %v819_v59 }
 0x15d   :  { %v1472_v60 = vpop.eup %1471 }
 0x15e   :  { %v821_v61 = vmul.f32 %v1472_v60, %v818_v58 }
 0x160   :  { %v822_v62 = vmul.f32 %v821_v61, %v813_v53  ;;  %v1138_v53 = vld [vmem:[%s1690_s11] sm:$0x1] }
 0x161   :  { %v1152_v54 = vsel %vm1150_vm7, %v1138_v53, 0 }
 0x1b0   :  { %v825_v63 = vpop.permute.xlu0 %824 }
 0x1b1   :  { %v827_v0 = vadd.f32 %v825_v63, %v822_v62 }
 0x1b3   :  { %1274 = vmatmul.mubr.msk.f32.vlgmr.msra.gmra.mrb[8].mxu0 %vm852_vm1, %v827_v0 }
 0x1b4   :  { %1035 = vmatprep.mubr.f32.mxu0 %v1521_v21  ;;  %1004 = vmatpush1.bf16.msra.mxu0 %v998_v20 }
 0x1b5   :  { %1381 = vmatprep.subr.bf16.mxu0 %v1521_v21 }
 0x286   :  { %v890_v4 = vpop.f32.mrb[8].mxu0 }
 0x287   :  { %v902_v5 = vadd.f32 %v1275_v3, %v890_v4  ;;  %v892_v6 = vpop.f32.mrb[9].mxu0  ;;  %v1289_v4 = vld [vmem:[#allocation3] ss:$0 sm:$0xff] }
 0x289   :  { %v903_v7 = vmin.f32 %v902_v5, 20.0 }
 0x28b   :  { %v904_v8 = vmul.f32 1.442695, %v903_v7 }
 0x28d   :  { %1473 = vpow2.f32 %v904_v8 }
 0x297   :  { %v1474_v9 = vpop.eup %1473 }
 0x298   :  { %v906_v10 = vadd.f32 2.0, %v1474_v9 }
 0x29a   :  { %v907_v11 = vmul.f32 %v1474_v9, %v906_v10 }
 0x29c   :  { %v908_v12 = vadd.f32 2.0, %v907_v11 }
 0x29e   :  { %1475 = vrcp.f32 %v908_v12 }
 0x2a8   :  { %v1476_v13 = vpop.eup %1475 }
 0x2a9   :  { %v910_v14 = vmul.f32 %v1476_v13, %v907_v11 }
 0x2ab   :  { %v911_v15 = vmul.f32 %v910_v14, %v902_v5 }
 0x2ad   :  { %v912_v16 = vadd.f32 %v911_v15, %v892_v6 }
 0x2af   :  { %1278 = vmatmul.mubr.msk.f32.vlgmr.msra.gmra.mrb[8].mxu1 %vm925_vm2, %v912_v16 }
 0x2b0   :  { %1113 = vmatprep.mubr.f32.mxu1 %v1521_v21  ;;  %1082 = vmatpush1.bf16.msra.mxu1 %v1076_v38 }
 0x382   :  { %v963_v23 = vpop.f32.mrb[8].mxu1 }
 0x383   :  { %v975_v24 = vadd.f32 %v1279_v22, %v963_v23  ;;  %v965_v25 = vpop.f32.mrb[9].mxu1 }
 0x385   :  { %v976_v26 = vmin.f32 %v975_v24, 20.0 }
 0x387   :  { %v977_v27 = vmul.f32 1.442695, %v976_v26 }
 0x389   :  { %1477 = vpow2.f32 %v977_v27 }
 0x393   :  { %v1478_v28 = vpop.eup %1477 }
 0x394   :  { %v979_v29 = vadd.f32 2.0, %v1478_v28 }
 0x396   :  { %v980_v30 = vmul.f32 %v1478_v28, %v979_v29 }
 0x398   :  { %v981_v31 = vadd.f32 2.0, %v980_v30 }
 0x39a   :  { %1479 = vrcp.f32 %v981_v31 }
 0x3a4   :  { %v1480_v32 = vpop.eup %1479 }
 0x3a5   :  { %v983_v33 = vmul.f32 %v1480_v32, %v980_v30 }
 0x3a7   :  { %v984_v34 = vmul.f32 %v983_v33, %v975_v24 }
 0x3a9   :  { %v985_v35 = vadd.f32 %v984_v34, %v965_v25 }
 0x3ab   :  { %1283 = vmatmul.mubr.msk.f32.vlgmr.msra.gmra.mrb[10].mxu0 %vm992_vm4, %v985_v35 }
 0x3ac   :  { %1382 = vmatpush3.bf16.msra.mxu0 %v1152_v54  ;;  %1383 = vmatprep.mubr.msk.f32.mxu0 %vm1523_vm8, %v1521_v21 }
 0x47e   :  { %v1037_v40 = vpop.f32.mrb[10].mxu0 }
 0x47f   :  { %v1049_v41 = vadd.f32 %v1284_v39, %v1037_v40  ;;  %v1039_v42 = vpop.f32.mrb[11].mxu0 }
 0x481   :  { %v1050_v43 = vmin.f32 %v1049_v41, 20.0 }
 0x483   :  { %v1051_v44 = vmul.f32 1.442695, %v1050_v43 }
 0x485   :  { %1481 = vpow2.f32 %v1051_v44 }
 0x48f   :  { %v1482_v45 = vpop.eup %1481 }
 0x490   :  { %v1053_v46 = vadd.f32 2.0, %v1482_v45 }
 0x492   :  { %v1054_v47 = vmul.f32 %v1482_v45, %v1053_v46 }
 0x494   :  { %v1055_v48 = vadd.f32 2.0, %v1054_v47 }
 0x496   :  { %1483 = vrcp.f32 %v1055_v48 }
 0x4a0   :  { %v1484_v49 = vpop.eup %1483 }
 0x4a1   :  { %v1057_v50 = vmul.f32 %v1484_v49, %v1054_v47 }
 0x4a3   :  { %v1058_v51 = vmul.f32 %v1057_v50, %v1049_v41 }
 0x4a5   :  { %v1059_v52 = vadd.f32 %v1058_v51, %v1039_v42 }
 0x4a7   :  { %1287 = vmatmul.mubr.msk.f32.vlgmr.msra.gmra.mrb[10].mxu1 %vm1070_vm6, %v1059_v52 }
 0x57a   :  { %v1115_v56 = vpop.f32.mrb[10].mxu1 }
 0x57b   :  { %v1127_v57 = vadd.f32 %v1288_v55, %v1115_v56  ;;  %v1117_v58 = vpop.f32.mrb[11].mxu1 }
 0x57d   :  { %v1128_v59 = vmin.f32 %v1127_v57, 20.0 }
 0x57f   :  { %v1129_v60 = vmul.f32 1.442695, %v1128_v59 }
 0x581   :  { %1485 = vpow2.f32 %v1129_v60 }
 0x58b   :  { %v1486_v61 = vpop.eup %1485 }
 0x58c   :  { %v1131_v62 = vadd.f32 2.0, %v1486_v61 }
 0x58e   :  { %v1132_v63 = vmul.f32 %v1486_v61, %v1131_v62 }
 0x590   :  { %v1133_v0 = vadd.f32 2.0, %v1132_v63 }
 0x592   :  { %1487 = vrcp.f32 %v1133_v0 }
 0x59c   :  { %v1488_v1 = vpop.eup %1487 }
 0x59d   :  { %v1135_v2 = vmul.f32 %v1488_v1, %v1132_v63 }
 0x59f   :  { %v1136_v3 = vmul.f32 %v1135_v2, %v1127_v57 }
 0x5a1   :  { %v1137_v21 = vadd.f32 %v1136_v3, %v1117_v58 }
 0x5a3   :  { %1384 = vmatmul.mubr.msk.f32.vlgmr.msra.gmra.mrb[12].mxu0 %vm1146_vm9, %v1137_v21 }
 0x676   :  { %v1188_v5 = vpop.f32.mrb[12].mxu0 }
 0x677   :  { %v1189_v6 = vadd.f32 %v1289_v4, %v1188_v5  ;;  %v1385_v7 = vpop.f32.mrb[13].mxu0 }
 0x679   :  { %v1192_v8 = vsub.f32 0.0, %v1189_v6 }
 0x67b   :  { %v1193_v9 = vmin.f32 %v1192_v8, 30.0 }
 0x67d   :  { %v1194_v10 = vmul.f32 1.442695, %v1193_v9 }
 0x67f   :  { %1489 = vpow2.f32 %v1194_v10 }
 0x689   :  { %v1490_v11 = vpop.eup %1489 }
 0x68a   :  { %v1196_v12 = vadd.f32 1.0, %v1490_v11 }
 0x68c   :  { %1491 = vrcp.f32 %v1196_v12 }
 0x696   :  { %v1492_v13 = vpop.eup %1491 }
 0x697   :  { %1199 = vst.msk [vmem:[%s1692_s13] sm:$0x3] %vm1198_vm10, %v1492_v13 }
 0x698   :  { %1204 = vsyncpa [#allocation5], 1 }

// kernel: fwd.1
= control target key start
LH: loop header
LB: loop body
LE: loop exit
PB: predicated region body
PF: predicated region fallthrough
CT: control target
= control target key end

     0   :  { %s1679_s0 = inlined_call_operand.vmem [shape: bf16[2,1024], index: 0, kind: input, shape index: {}]   ;;  %s1680_s1 = inlined_call_operand.hbm [shape: bf16[1024,64], index: 1, kind: input, shape index: {}]   ;;  %s1681_s2 = inlined_call_operand.vmem [shape: f32[1,64], index: 2, kind: input, shape index: {}]   ;;  %s1682_s3 = inlined_call_operand.vmem [shape: bf16[32,144], index: 3, kind: input, shape index: {}]   ;;  %s1683_s4 = inlined_call_operand.vmem [shape: f32[1,16], index: 4, kind: input, shape index: {}]   ;;  %s1684_s5 = inlined_call_operand.vmem [shape: bf16[16,136], index: 5, kind: input, shape index: {}]   ;;  %s1685_s6 = inlined_call_operand.vmem [shape: f32[1,8], index: 6, kind: input, shape index: {}]   ;;  %s1686_s7 = inlined_call_operand.vmem [shape: bf16[8,132], index: 7, kind: input, shape index: {}]   ;;  %s1687_s8 = inlined_call_operand.vmem [shape: f32[1,4], index: 8, kind: input, shape index: {}]   ;;  %s1688_s9 = inlined_call_operand.vmem [shape: bf16[4,130], index: 9, kind: input, shape index: {}]   ;;  %s1689_s10 = inlined_call_operand.vmem [shape: f32[1,2], index: 10, kind: input, shape index: {}]   ;;  %s1690_s11 = inlined_call_operand.vmem [shape: bf16[2,1], index: 11, kind: input, shape index: {}]   ;;  %s1691_s12 = inlined_call_operand.<no memory space> [shape: f32[1,1], index: 12, kind: input, shape index: {}]   ;;  %s1692_s13 = inlined_call_operand.vmem [shape: f32[2,1], index: 13, kind: output, shape index: {}]  }
   0x1   :  { %v18_v0 = vstv %s1691_s12 }
   0x2   :  { %19 = vst [vmem:[#allocation3] sm:$0x1] %v18_v0 }
   0x3   :  { %20 = vsyncpa [#allocation5], 0  ;;  %s1517_s27 = smov [#allocation4]   ;;  %s1493_s14 = scalar_lea.hbm %s1680_s1, 8192 }
   0x4   :  { %s28_s28 = sshll.u32 %s1517_s27, 4  ;;  %p1494_p0 = scmp.ne.s32.totalorder %s1680_s1, %s1493_s14  ;;  %s29_s28 = int_to_ptr.vmem [resolvable:$true] %s28_s28 }
   0x5   :  { %p1497_p1 = scmp.lt.u32.totalorder %s1493_s14, %s1680_s1 }
   0x7   :  { %p1499_p2 = pnand %p1497_p1, %p1494_p0 }
   0x9   :  { %1502 = shalt.err (!%p1499_p2)
}
   0xa   :  { %s1503_s12 = scalar_lea.vmem %s29_s28, 8192  ;;  %p1508_p4 = scmp.lt.s32.totalorder %s29_s28, %s29_s28 }
   0xb   :  { %p1504_p3 = scmp.ne.s32.totalorder %s29_s28, %s1503_s12  ;;  %p1509_p5 = scmp.lt.s32.totalorder %s1503_s12, %s1503_s12 }
   0xd   :  { %p1510_p6 = por %p1509_p5, %p1508_p4 }
   0xf   :  { %p1511_p7 = pnand %p1510_p6, %p1504_p3 }
  0x11   :  { %1514 = shalt.err (!%p1511_p7)
}
  0x12   :  { %s1518_s19 = smov 64   ;;  %s1519_s20 = smov 4  }
  0x13   :  { %34 = dma.hbm_to_vmem [thread:$0]  %s1680_s1, 8192, %s29_s28, [#allocation5], %s1518_s19, %s1518_s19, %s1519_s20  }
  0x14   :  { %1515 = dma.done.wait [#allocation5], 8192  }
  0x15   :  { %1516 = vsyncadd [#allocation5], 4294959104  ;;  %v1393_v1 = vld [vmem:[#allocation4 + $0x40] sm:$0xff]   ;;  %v1397_v5 = vld [vmem:[#allocation4 + $0x48] sm:$0xff]   ;;  %v1520_v23 = vmov 1966171168   ;;  %v202_v25 = vlaneseq }
  0x16   :  { %v1394_v2 = vld [vmem:[#allocation4 + $0xc0] sm:$0xff]   ;;  %1291 = vmatprep.subr.bf16.mxu0 %v1393_v1  ;;  %v1398_v6 = vld [vmem:[#allocation4 + $0xc8] sm:$0xff]   ;;  %v1401_v9 = vld [vmem:[#allocation4 + $0x50] sm:$0xff]   ;;  %v200_v24 = vunpack.c.l.s4 %v1520_v23  ;;  %vm65_vm0 = vcmask 517120   ;;  %s1522_s15 = smov 96   ;;  %vm852_vm1 = vcmask 261120  }
  0x17   :  { %v1395_v3 = vld [vmem:[#allocation4] sm:$0xff]   ;;  %1313 = vmatprep.subr.bf16.mxu1 %v1394_v2  ;;  %v1399_v7 = vld [vmem:[#allocation4 + $0x8] sm:$0xff]   ;;  %v1402_v10 = vld [vmem:[#allocation4 + $0xd0] sm:$0xff]   ;;  %v203_v31 = vshrl.u32 %v202_v25, 7  ;;  %vm925_vm2 = vcmask 130048   ;;  %vm996_vm3 = vcmask 1043456  }
  0x18   :  { %v1396_v4 = vld [vmem:[#allocation4 + $0x80] sm:$0xff]   ;;  %1292 = vmatpush3.bf16.msra.mxu0 %v1395_v3  ;;  %v1400_v8 = vld [vmem:[#allocation4 + $0x88] sm:$0xff]   ;;  %v1403_v11 = vld [vmem:[#allocation4 + $0x10] sm:$0xff]   ;;  %v201_v30 = vunpack.c.0.s8 %v200_v24  ;;  %vm992_vm4 = vcmask 64512   ;;  %vm1074_vm5 = vcmask 1041408   ;;  %vm1070_vm6 = vcmask 31744  }
  0x19   :  { %1314 = vmatpush3.bf16.msra.mxu1 %v1396_v4  ;;  %1293 = vmatprep.subr.bf16.mxu0 %v1397_v5  ;;  %v1404_v12 = vld [vmem:[#allocation4 + $0x90] sm:$0xff]   ;;  %v1405_v13 = vld [vmem:[#allocation4 + $0x58] sm:$0xff]   ;;  %v1409_v17 = vld [vmem:[#allocation4 + $0x60] sm:$0xff]   ;;  %vm1150_vm7 = vcmask 1040384   ;;  %vm1523_vm8 = vmmov 0   ;;  %vm1146_vm9 = vcmask 15360  }
  0x1a   :  { %1315 = vmatprep.subr.bf16.mxu1 %v1398_v6  ;;  %v1406_v14 = vld [vmem:[#allocation4 + $0xd8] sm:$0xff]   ;;  %v1410_v18 = vld [vmem:[#allocation4 + $0xe0] sm:$0xff]   ;;  %v1413_v21 = vld [vmem:[#allocation4 + $0x68] sm:$0xff]   ;;  %v1609_v36 = vsub.s32 %v201_v30, %v203_v31  ;;  %vm1198_vm10 = vcmask 1024  }
  0x1b   :  { %v1407_v15 = vld [vmem:[#allocation4 + $0x18] sm:$0xff]   ;;  %v1411_v19 = vld [vmem:[#allocation4 + $0x20] sm:$0xff]   ;;  %v1414_v22 = vld [vmem:[#allocation4 + $0xe8] sm:$0xff]  }
  0x1c   :  { %1294 = vmatpush3.bf16.msra.mxu0 %v1399_v7  ;;  %v1408_v16 = vld [vmem:[#allocation4 + $0x98] sm:$0xff]   ;;  %v1412_v20 = vld [vmem:[#allocation4 + $0xa0] sm:$0xff]   ;;  %v1415_v26 = vld [vmem:[#allocation4 + $0x28] sm:$0xff]  }
  0x1d   :  { %1316 = vmatpush3.bf16.msra.mxu1 %v1400_v8  ;;  %1295 = vmatprep.subr.bf16.mxu0 %v1401_v9  ;;  %v1416_v27 = vld [vmem:[#allocation4 + $0xa8] sm:$0xff]   ;;  %v1417_v28 = vld [vmem:[#allocation4 + $0x70] sm:$0xff]   ;;  %v1421_v34 = vld [vmem:[#allocation4 + $0x78] sm:$0xff]  }
  0x1e   :  { %1317 = vmatprep.subr.bf16.mxu1 %v1402_v10  ;;  %v1418_v29 = vld [vmem:[#allocation4 + $0xf0] sm:$0xff]   ;;  %v1422_v35 = vld [vmem:[#allocation4 + $0xf8] sm:$0xff]   ;;  %v1426_v42 = vld [vmem:[#allocation4 + $0x140] sm:$0xff]  }
  0x1f   :  { %v1419_v32 = vld [vmem:[#allocation4 + $0x30] sm:$0xff]   ;;  %v1423_v37 = vld [vmem:[#allocation4 + $0x38] sm:$0xff]   ;;  %v1427_v43 = vld [vmem:[#allocation4 + $0x1c0] sm:$0xff]  }
  0x20   :  { %1296 = vmatpush3.bf16.msra.mxu0 %v1403_v11  ;;  %v1420_v33 = vld [vmem:[#allocation4 + $0xb0] sm:$0xff]   ;;  %v1424_v38 = vld [vmem:[#allocation4 + $0xb8] sm:$0xff]   ;;  %v1428_v47 = vld [vmem:[#allocation4 + $0x100] sm:$0xff]  }
  0x21   :  { %1318 = vmatpush3.bf16.msra.mxu1 %v1404_v12  ;;  %1297 = vmatprep.subr.bf16.mxu0 %v1405_v13  ;;  %v68_v39 = vld [vmem:[%s1679_s0] sm:$0xff]  ;;  %v1430_v52 = vld [vmem:[#allocation4 + $0x148] sm:$0xff]   ;;  %v1434_v59 = vld [vmem:[#allocation4 + $0x150] sm:$0xff]  }
  0x22   :  { %1319 = vmatprep.subr.bf16.mxu1 %v1406_v14  ;;  %v198_v40 = vcombine.high %v68_v39, %v68_v39  ;;  %v205_v41 = vrot.slane %v68_v39, %v1609_v36  ;;  %v1429_v49 = vld [vmem:[#allocation4 + $0x180] sm:$0xff]   ;;  %v1431_v54 = vld [vmem:[#allocation4 + $0x1c8] sm:$0xff]   ;;  %v1435_v60 = vld [vmem:[#allocation4 + $0x1d0] sm:$0xff]  }
  0x23   :  { %v1432_v56 = vld [vmem:[#allocation4 + $0x108] sm:$0xff]   ;;  %v1436_v61 = vld [vmem:[#allocation4 + $0x110] sm:$0xff]   ;;  %v1438_v63 = vld [vmem:[#allocation4 + $0x158] sm:$0xff]  }
  0x24   :  { %1298 = vmatpush3.bf16.msra.mxu0 %v1407_v15  ;;  %v213_v44 = vcombine.high %v205_v41, %v205_v41  ;;  %v221_v45 = vrot.slane %v205_v41, %v1609_v36  ;;  %v1617_v46 = vrot.slane %v198_v40, %v1609_v36  ;;  %v1433_v57 = vld [vmem:[#allocation4 + $0x188] sm:$0xff]   ;;  %v1437_v62 = vld [vmem:[#allocation4 + $0x190] sm:$0xff]   ;;  %v1439_v0 = vld [vmem:[#allocation4 + $0x1d8] sm:$0xff]  }
  0x25   :  { %1320 = vmatpush3.bf16.msra.mxu1 %v1408_v16  ;;  %1299 = vmatprep.subr.bf16.mxu0 %v1409_v17  ;;  %v1440_v1 = vld [vmem:[#allocation4 + $0x118] sm:$0xff]   ;;  %v1442_v3 = vld [vmem:[#allocation4 + $0x160] sm:$0xff]   ;;  %v1446_v7 = vld [vmem:[#allocation4 + $0x168] sm:$0xff]  }
  0x26   :  { %1321 = vmatprep.subr.bf16.mxu1 %v1410_v18  ;;  %v235_v48 = vrot.slane %v213_v44, %v1609_v36  ;;  %v214_v50 = vcombine.high %v1617_v46, %v1617_v46  ;;  %v243_v51 = vcombine.high %v221_v45, %v221_v45  ;;  %v1441_v2 = vld [vmem:[#allocation4 + $0x198] sm:$0xff]   ;;  %v1443_v4 = vld [vmem:[#allocation4 + $0x1e0] sm:$0xff]   ;;  %v1447_v8 = vld [vmem:[#allocation4 + $0x1e8] sm:$0xff]   ;;  %v228_v18 = vrot.slane %v1617_v46, %v1609_v36 }
  0x27   :  { %v1444_v5 = vld [vmem:[#allocation4 + $0x120] sm:$0xff]   ;;  %v1448_v9 = vld [vmem:[#allocation4 + $0x128] sm:$0xff]   ;;  %v1450_v11 = vld [vmem:[#allocation4 + $0x170] sm:$0xff]  }
  0x28   :  { %1300 = vmatpush3.bf16.msra.mxu0 %v1411_v19  ;;  %671 = vmatprep.mubr.bf16.mxu0 %v235_v48  ;;  %v245_v53 = vcombine.high %v235_v48, %v235_v48  ;;  %v242_v55 = vrot.slane %v214_v50, %v1609_v36  ;;  %v1445_v6 = vld [vmem:[#allocation4 + $0x1a0] sm:$0xff]   ;;  %v1449_v10 = vld [vmem:[#allocation4 + $0x1a8] sm:$0xff]   ;;  %v1451_v12 = vld [vmem:[#allocation4 + $0x1f0] sm:$0xff]  }
  0x29   :  { %1322 = vmatpush3.bf16.msra.mxu1 %v1412_v20  ;;  %1301 = vmatprep.subr.bf16.mxu0 %v1413_v21  ;;  %v1452_v13 = vld [vmem:[#allocation4 + $0x130] sm:$0xff]   ;;  %v1454_v15 = vld [vmem:[#allocation4 + $0x178] sm:$0xff]   ;;  %v244_v20 = vcombine.high %v228_v18, %v228_v18  ;;  %v1521_v21 = vmov 0.0   ;;  %v1460_v23 = vld [vmem:[%s1682_s3 + $0x4] ss:$8 sps:$4 sm:$0xff]  }
  0x2a   :  { %1323 = vmatprep.subr.bf16.mxu1 %v1414_v22  ;;  %711 = vmatprep.mubr.bf16.mxu1 %v245_v53  ;;  %v246_v58 = vcombine.high %v242_v55, %v242_v55  ;;  %v1453_v14 = vld [vmem:[#allocation4 + $0x1b0] sm:$0xff]   ;;  %v1455_v16 = vld [vmem:[#allocation4 + $0x1f8] sm:$0xff]   ;;  %66 = vst.msk [vmem:[#allocation2] sm:$0x3] %vm65_vm0, %v1521_v21 }
  0x2b   :  { %v1456_v17 = vld [vmem:[#allocation4 + $0x138] sm:$0xff]  }
  0x2c   :  { %1302 = vmatpush3.bf16.msra.mxu0 %v1415_v26  ;;  %v1457_v19 = vld [vmem:[#allocation4 + $0x1b8] sm:$0xff]  }
  0x2d   :  { %1324 = vmatpush3.bf16.msra.mxu1 %v1416_v27  ;;  %1303 = vmatprep.subr.bf16.mxu0 %v1417_v28  ;;  %v1458_v22 = vld [vmem:[%s1682_s3] ss:$8 sps:$4 sm:$0xff]   ;;  %v1463_v24 = vld [vmem:[%s1682_s3 + $0x14] ss:$8 sps:$4 sm:$0xff]   ;;  %v1461_v25 = vld [vmem:[%s1682_s3 + $0x10] ss:$8 sps:$4 sm:$0xff]  }
  0x2e   :  { %1325 = vmatprep.subr.bf16.mxu1 %v1418_v29 }
  0x30   :  { %1304 = vmatpush3.bf16.msra.mxu0 %v1419_v32 }
  0x31   :  { %1326 = vmatpush3.bf16.msra.mxu1 %v1420_v33  ;;  %1305 = vmatprep.subr.bf16.mxu0 %v1421_v34 }
  0x32   :  { %1327 = vmatprep.subr.bf16.mxu1 %v1422_v35 }
  0x34   :  { %1306 = vmatpush3.bf16.msra.mxu0 %v1423_v37 }
  0x35   :  { %1328 = vmatpush3.bf16.msra.mxu1 %v1424_v38  ;;  %1335 = vmatprep.subr.bf16.mxu0 %v1426_v42 }
  0x36   :  { %1357 = vmatprep.subr.bf16.mxu1 %v1427_v43 }
  0x37   :  { %672 = vmatmul.mubr.bf16.vlgmr.msra.gmra.mrb[0].mxu0 %v221_v45 }
  0x38   :  { %1336 = vmatpush3.bf16.msra.mxu0 %v1428_v47  ;;  %712 = vmatmul.mubr.bf16.vlgmr.msra.gmra.mrb[0].mxu1 %v243_v51  ;;  %v67_v47 = vld [vmem:[#allocation2] sm:$0x3] }
  0x39   :  { %1337 = vmatprep.subr.bf16.mxu0 %v1430_v52  ;;  %1358 = vmatpush3.bf16.msra.mxu1 %v1429_v49  ;;  %v1269_v51 = vld [vmem:[%s1681_s2] ss:$0 sm:$0xff] }
  0x3a   :  { %751 = vmatprep.mubr.bf16.mxu0 %v242_v55  ;;  %1359 = vmatprep.subr.bf16.mxu1 %v1431_v54 }
  0x3b   :  { %791 = vmatprep.mubr.bf16.mxu1 %v246_v58 }
  0x3c   :  { %1338 = vmatpush3.bf16.msra.mxu0 %v1432_v56 }
  0x3d   :  { %1339 = vmatprep.subr.bf16.mxu0 %v1434_v59  ;;  %1360 = vmatpush3.bf16.msra.mxu1 %v1433_v57 }
  0x3e   :  { %1361 = vmatprep.subr.bf16.mxu1 %v1435_v60 }
  0x40   :  { %1340 = vmatpush3.bf16.msra.mxu0 %v1436_v61 }
  0x41   :  { %1341 = vmatprep.subr.bf16.mxu0 %v1438_v63  ;;  %1362 = vmatpush3.bf16.msra.mxu1 %v1437_v62 }
  0x42   :  { %1363 = vmatprep.subr.bf16.mxu1 %v1439_v0 }
  0x44   :  { %1342 = vmatpush3.bf16.msra.mxu0 %v1440_v1  ;;  %v1466_v1 = vld [vmem:[%s1684_s5 + $0x4] ss:$8 sps:$4 sm:$0xff]  }
  0x45   :  { %1343 = vmatprep.subr.bf16.mxu0 %v1442_v3  ;;  %1364 = vmatpush3.bf16.msra.mxu1 %v1441_v2  ;;  %v1464_v2 = vld [vmem:[%s1684_s5] ss:$8 sps:$4 sm:$0xff]  }
  0x46   :  { %1365 = vmatprep.subr.bf16.mxu1 %v1443_v4  ;;  %v1275_v3 = vld [vmem:[%s1683_s4] ss:$0 sm:$0xff] }
  0x48   :  { %1344 = vmatpush3.bf16.msra.mxu0 %v1444_v5 }
  0x49   :  { %1345 = vmatprep.subr.bf16.mxu0 %v1446_v7  ;;  %1366 = vmatpush3.bf16.msra.mxu1 %v1445_v6 }
  0x4a   :  { %1367 = vmatprep.subr.bf16.mxu1 %v1447_v8 }
  0x4c   :  { %1346 = vmatpush3.bf16.msra.mxu0 %v1448_v9 }
  0x4d   :  { %1347 = vmatprep.subr.bf16.mxu0 %v1450_v11  ;;  %1368 = vmatpush3.bf16.msra.mxu1 %v1449_v10 }
  0x4e   :  { %1369 = vmatprep.subr.bf16.mxu1 %v1451_v12 }
  0x50   :  { %1348 = vmatpush3.bf16.msra.mxu0 %v1452_v13 }
  0x51   :  { %1349 = vmatprep.subr.bf16.mxu0 %v1454_v15  ;;  %1370 = vmatpush3.bf16.msra.mxu1 %v1453_v14 }
  0x52   :  { %1371 = vmatprep.subr.bf16.mxu1 %v1455_v16 }
  0x54   :  { %1350 = vmatpush3.bf16.msra.mxu0 %v1456_v17  ;;  %v986_v17 = vld [vmem:[%s1686_s7] sm:$0xff] }
  0x55   :  { %1372 = vmatpush3.bf16.msra.mxu1 %v1457_v19  ;;  %856 = vmatprep.subr.bf16.mxu0 %v1460_v23  ;;  %v1280_v19 = vcombine.low %v986_v17, %v986_v17 }
  0x56   :  { %929 = vmatprep.subr.bf16.mxu1 %v1466_v1 }
  0x57   :  { %752 = vmatmul.mubr.bf16.vlgmr.msra.gmra.mrb[4].mxu0 %v228_v18  ;;  %v1281_v18 = vcombine.high %v986_v17, %v986_v17 }
  0x58   :  { %792 = vmatmul.mubr.bf16.vlgmr.msra.gmra.mrb[4].mxu1 %v244_v20  ;;  %888 = vmatprep.mubr.f32.mxu0 %v1521_v21  ;;  %v998_v20 = vsel %vm996_vm3, %v1280_v19, 0 }
  0x59   :  { %961 = vmatprep.mubr.f32.mxu1 %v1521_v21  ;;  %857 = vmatpush1.bf16.msra.mxu0 %v1458_v22  ;;  %v1279_v22 = vld [vmem:[%s1685_s6] ss:$0 sm:$0xff] }
  0x5a   :  { %858 = vmatprep.subr.bf16.mxu0 %v1463_v24  ;;  %930 = vmatpush1.bf16.msra.mxu1 %v1464_v2 }
  0x5d   :  { %859 = vmatpush1.bf16.msra.mxu0 %v1461_v25 }
  0x5e   :  { %1282 = vmatprep.subr.msk.bf16.mxu0 %vm996_vm3, %v1281_v18 }
 0x10a   :  { %v1307_v26 = vpop.f32.mrb[0].mxu0 }
 0x10b   :  { %v1308_v27 = vpop.f32.mrb[1].mxu0  ;;  %v1329_v28 = vpop.f32.mrb[0].mxu1 }
 0x10c   :  { %v1309_v29 = vadd.f32 %v1308_v27, %v1307_v26  ;;  %v1310_v30 = vpop.f32.mrb[2].mxu0  ;;  %v1330_v31 = vpop.f32.mrb[1].mxu1 }
 0x10d   :  { %v1311_v32 = vpop.f32.mrb[3].mxu0  ;;  %v1331_v33 = vadd.f32 %v1330_v31, %v1329_v28  ;;  %v1332_v34 = vpop.f32.mrb[2].mxu1 }
 0x10e   :  { %v1333_v35 = vpop.f32.mrb[3].mxu1 }
 0x10f   :  { %v714_v36 = vadd.f32 %v1331_v33, %v1309_v29 }
 0x12a   :  { %v1351_v37 = vpop.f32.mrb[4].mxu0 }
 0x12b   :  { %v1352_v38 = vpop.f32.mrb[5].mxu0  ;;  %v1373_v39 = vpop.f32.mrb[4].mxu1 }
 0x12c   :  { %v1353_v40 = vadd.f32 %v1352_v38, %v1351_v37  ;;  %v1354_v41 = vpop.f32.mrb[6].mxu0  ;;  %v1374_v42 = vpop.f32.mrb[5].mxu1 }
 0x12d   :  { %v1355_v43 = vpop.f32.mrb[7].mxu0  ;;  %v1375_v45 = vadd.f32 %v1374_v42, %v1373_v39  ;;  %v1376_v46 = vpop.f32.mrb[6].mxu1  ;;  %v1284_v39 = vld [vmem:[%s1687_s8] ss:$0 sm:$0xff] }
 0x12e   :  { %v754_v44 = vadd.f32 %v1353_v40, %v714_v36  ;;  %v1377_v48 = vpop.f32.mrb[7].mxu1  ;;  %v1285_v36 = vld.sshfl [vmem:[%s1688_s9] sm:$0x33 pattern:$0x76325410] }
 0x12f   :  { %v1069_v37 = vcombine.high %v1285_v36, %v1285_v36  ;;  %v1076_v38 = vsel %vm1074_vm5, %v1285_v36, 0 }
 0x130   :  { %v794_v49 = vadd.f32 %v1375_v45, %v754_v44 }
 0x131   :  { %1286 = vmatprep.subr.msk.bf16.mxu1 %vm1074_vm5, %v1069_v37 }
 0x132   :  { %v799_v50 = vadd.f32 %v794_v49, %v67_v47 }
 0x134   :  { %801 = vst.msk [vmem:[#allocation2] sm:$0x3] %vm65_vm0, %v799_v50 }
 0x13b   :  { %v805_v52 = vld [vmem:[#allocation2] sm:$0x3] }
 0x13c   :  { %v813_v53 = vadd.f32 %v1269_v51, %v805_v52 }
 0x13e   :  { %824 = vrot.lane.b32.xlu0 %v813_v53, %s1522_s15  ;;  %v814_v54 = vmin.f32 %v813_v53, 20.0 }
 0x140   :  { %v815_v55 = vmul.f32 1.442695, %v814_v54 }
 0x142   :  { %1469 = vpow2.f32 %v815_v55  ;;  %v1288_v55 = vld [vmem:[%s1689_s10] ss:$0 sm:$0xff] }
 0x14c   :  { %v1470_v56 = vpop.eup %1469 }
 0x14d   :  { %v817_v57 = vadd.f32 2.0, %v1470_v56 }
 0x14f   :  { %v818_v58 = vmul.f32 %v1470_v56, %v817_v57 }
 0x151   :  { %v819_v59 = vadd.f32 2.0, %v818_v58 }
 0x153   :  { %1471 = vrcp.f32 %v819_v59 }
 0x15d   :  { %v1472_v60 = vpop.eup %1471 }
 0x15e   :  { %v821_v61 = vmul.f32 %v1472_v60, %v818_v58 }
 0x160   :  { %v822_v62 = vmul.f32 %v821_v61, %v813_v53  ;;  %v1138_v53 = vld [vmem:[%s1690_s11] sm:$0x1] }
 0x161   :  { %v1152_v54 = vsel %vm1150_vm7, %v1138_v53, 0 }
 0x1b0   :  { %v825_v63 = vpop.permute.xlu0 %824 }
 0x1b1   :  { %v827_v0 = vadd.f32 %v825_v63, %v822_v62 }
 0x1b3   :  { %1274 = vmatmul.mubr.msk.f32.vlgmr.msra.gmra.mrb[8].mxu0 %vm852_vm1, %v827_v0 }
 0x1b4   :  { %1035 = vmatprep.mubr.f32.mxu0 %v1521_v21  ;;  %1004 = vmatpush1.bf16.msra.mxu0 %v998_v20 }
 0x1b5   :  { %1381 = vmatprep.subr.bf16.mxu0 %v1521_v21 }
 0x286   :  { %v890_v4 = vpop.f32.mrb[8].mxu0 }
 0x287   :  { %v902_v5 = vadd.f32 %v1275_v3, %v890_v4  ;;  %v892_v6 = vpop.f32.mrb[9].mxu0  ;;  %v1289_v4 = vld [vmem:[#allocation3] ss:$0 sm:$0xff] }
 0x289   :  { %v903_v7 = vmin.f32 %v902_v5, 20.0 }
 0x28b   :  { %v904_v8 = vmul.f32 1.442695, %v903_v7 }
 0x28d   :  { %1473 = vpow2.f32 %v904_v8 }
 0x297   :  { %v1474_v9 = vpop.eup %1473 }
 0x298   :  { %v906_v10 = vadd.f32 2.0, %v1474_v9 }
 0x29a   :  { %v907_v11 = vmul.f32 %v1474_v9, %v906_v10 }
 0x29c   :  { %v908_v12 = vadd.f32 2.0, %v907_v11 }
 0x29e   :  { %1475 = vrcp.f32 %v908_v12 }
 0x2a8   :  { %v1476_v13 = vpop.eup %1475 }
 0x2a9   :  { %v910_v14 = vmul.f32 %v1476_v13, %v907_v11 }
 0x2ab   :  { %v911_v15 = vmul.f32 %v910_v14, %v902_v5 }
 0x2ad   :  { %v912_v16 = vadd.f32 %v911_v15, %v892_v6 }
 0x2af   :  { %1278 = vmatmul.mubr.msk.f32.vlgmr.msra.gmra.mrb[8].mxu1 %vm925_vm2, %v912_v16 }
 0x2b0   :  { %1113 = vmatprep.mubr.f32.mxu1 %v1521_v21  ;;  %1082 = vmatpush1.bf16.msra.mxu1 %v1076_v38 }
 0x382   :  { %v963_v23 = vpop.f32.mrb[8].mxu1 }
 0x383   :  { %v975_v24 = vadd.f32 %v1279_v22, %v963_v23  ;;  %v965_v25 = vpop.f32.mrb[9].mxu1 }
 0x385   :  { %v976_v26 = vmin.f32 %v975_v24, 20.0 }
 0x387   :  { %v977_v27 = vmul.f32 1.442695, %v976_v26 }
 0x389   :  { %1477 = vpow2.f32 %v977_v27 }
 0x393   :  { %v1478_v28 = vpop.eup %1477 }
 0x394   :  { %v979_v29 = vadd.f32 2.0, %v1478_v28 }
 0x396   :  { %v980_v30 = vmul.f32 %v1478_v28, %v979_v29 }
 0x398   :  { %v981_v31 = vadd.f32 2.0, %v980_v30 }
 0x39a   :  { %1479 = vrcp.f32 %v981_v31 }
 0x3a4   :  { %v1480_v32 = vpop.eup %1479 }
 0x3a5   :  { %v983_v33 = vmul.f32 %v1480_v32, %v980_v30 }
 0x3a7   :  { %v984_v34 = vmul.f32 %v983_v33, %v975_v24 }
 0x3a9   :  { %v985_v35 = vadd.f32 %v984_v34, %v965_v25 }
 0x3ab   :  { %1283 = vmatmul.mubr.msk.f32.vlgmr.msra.gmra.mrb[10].mxu0 %vm992_vm4, %v985_v35 }
 0x3ac   :  { %1382 = vmatpush3.bf16.msra.mxu0 %v1152_v54  ;;  %1383 = vmatprep.mubr.msk.f32.mxu0 %vm1523_vm8, %v1521_v21 }
 0x47e   :  { %v1037_v40 = vpop.f32.mrb[10].mxu0 }
 0x47f   :  { %v1049_v41 = vadd.f32 %v1284_v39, %v1037_v40  ;;  %v1039_v42 = vpop.f32.mrb[11].mxu0 }
 0x481   :  { %v1050_v43 = vmin.f32 %v1049_v41, 20.0 }
 0x483   :  { %v1051_v44 = vmul.f32 1.442695, %v1050_v43 }
 0x485   :  { %1481 = vpow2.f32 %v1051_v44 }
 0x48f   :  { %v1482_v45 = vpop.eup %1481 }
 0x490   :  { %v1053_v46 = vadd.f32 2.0, %v1482_v45 }
 0x492   :  { %v1054_v47 = vmul.f32 %v1482_v45, %v1053_v46 }
 0x494   :  { %v1055_v48 = vadd.f32 2.0, %v1054_v47 }
 0x496   :  { %1483 = vrcp.f32 %v1055_v48 }
 0x4a0   :  { %v1484_v49 = vpop.eup %1483 }
 0x4a1   :  { %v1057_v50 = vmul.f32 %v1484_v49, %v1054_v47 }
 0x4a3   :  { %v1058_v51 = vmul.f32 %v1057_v50, %v1049_v41 }
 0x4a5   :  { %v1059_v52 = vadd.f32 %v1058_v51, %v1039_v42 }
 0x4a7   :  { %1287 = vmatmul.mubr.msk.f32.vlgmr.msra.gmra.mrb[10].mxu1 %vm1070_vm6, %v1059_v52 }
 0x57a   :  { %v1115_v56 = vpop.f32.mrb[10].mxu1 }
 0x57b   :  { %v1127_v57 = vadd.f32 %v1288_v55, %v1115_v56  ;;  %v1117_v58 = vpop.f32.mrb[11].mxu1 }
 0x57d   :  { %v1128_v59 = vmin.f32 %v1127_v57, 20.0 }
 0x57f   :  { %v1129_v60 = vmul.f32 1.442695, %v1128_v59 }
 0x581   :  { %1485 = vpow2.f32 %v1129_v60 }
 0x58b   :  { %v1486_v61 = vpop.eup %1485 }
 0x58c   :  { %v1131_v62 = vadd.f32 2.0, %v1486_v61 }
 0x58e   :  { %v1132_v63 = vmul.f32 %v1486_v61, %v1131_v62 }
 0x590   :  { %v1133_v0 = vadd.f32 2.0, %v1132_v63 }
 0x592   :  { %1487 = vrcp.f32 %v1133_v0 }
 0x59c   :  { %v1488_v1 = vpop.eup %1487 }
 0x59d   :  { %v1135_v2 = vmul.f32 %v1488_v1, %v1132_v63 }
 0x59f   :  { %v1136_v3 = vmul.f32 %v1135_v2, %v1127_v57 }
 0x5a1   :  { %v1137_v21 = vadd.f32 %v1136_v3, %v1117_v58 }
 0x5a3   :  { %1384 = vmatmul.mubr.msk.f32.vlgmr.msra.gmra.mrb[12].mxu0 %vm1146_vm9, %v1137_v21 }
 0x676   :  { %v1188_v5 = vpop.f32.mrb[12].mxu0 }
 0x677   :  { %v1189_v6 = vadd.f32 %v1289_v4, %v1188_v5  ;;  %v1385_v7 = vpop.f32.mrb[13].mxu0 }
 0x679   :  { %v1192_v8 = vsub.f32 0.0, %v1189_v6 }
 0x67b   :  { %v1193_v9 = vmin.f32 %v1192_v8, 30.0 }
 0x67d   :  { %v1194_v10 = vmul.f32 1.442695, %v1193_v9 }
 0x67f   :  { %1489 = vpow2.f32 %v1194_v10 }
 0x689   :  { %v1490_v11 = vpop.eup %1489 }
 0x68a   :  { %v1196_v12 = vadd.f32 1.0, %v1490_v11 }
 0x68c   :  { %1491 = vrcp.f32 %v1196_v12 }
 0x696   :  { %v1492_v13 = vpop.eup %1491 }
 0x697   :  { %1199 = vst.msk [vmem:[%s1692_s13] sm:$0x3] %vm1198_vm10, %v1492_v13 }
 0x698   :  { %1204 = vsyncpa [#allocation5], 1 }

</bundles_post_ra>
